<compile_context>
chip_gen: v5e
topology: v5e:2x2
jax: 0.10.0
libtpu: 0.0.40
codegen_flags: <defaults>
</compile_context>

<pallas_src>
import functools
import math

import jax
import jax.numpy as jnp
from jax.experimental import pallas as pl
from jax.experimental.pallas import tpu as pltpu

_VMEM_LIMIT_BYTES = 48 * 1024 * 1024   # headroom under v7x's 64 MiB physical VMEM
_ROW_TILE = 512                        # token rows per grid step
_COL_TILE = 512                        # output columns per grid step
_LN_EPS = 1e-6


def _row_block(m, target=_ROW_TILE):
    # cdiv grid + masked stores handle the ragged edge, so no divisor fallback.
    return m if m <= target else target


def _col_block(n, target=_COL_TILE):
    if n <= target:
        return n
    for bn in range(target, 127, -128):     # prefer an exact multiple-of-128 divisor
        if n % bn == 0:
            return bn
    return target                           # ragged edge handled by masked stores


def _layernorm(v, eps=_LN_EPS):
    mu = jnp.mean(v, axis=-1, keepdims=True)
    var = jnp.mean((v - mu) ** 2, axis=-1, keepdims=True)
    return (v - mu) * jax.lax.rsqrt(var + eps)


def _adaln(x_f32, pro_f32):
    # pro rows: [shift, scale]
    shift = pro_f32[0:1, :]
    scale = pro_f32[1:2, :]
    return _layernorm(x_f32) * (1.0 + scale) + shift


# ---------------------------------------------------------------------------
# Generic 2-D row/column-tiled linear:  y = act_out(act_in(x) @ W + b)
# Used for patch embed, timestep/class MLPs and the hoisted condition GEMM.
# ---------------------------------------------------------------------------
def _linear_kernel(x_ref, w_ref, b_ref, o_ref, *, act_in, act_out):
    if act_in == 'silu':
        xb = jax.nn.silu(x_ref[...].astype(jnp.float32)).astype(jnp.bfloat16)
    else:
        xb = x_ref[...].astype(jnp.bfloat16)
    y = jnp.dot(xb, w_ref[...].astype(jnp.bfloat16),
                preferred_element_type=jnp.float32)
    y = y + b_ref[...].astype(jnp.float32)
    if act_out == 'silu':
        y = jax.nn.silu(y)
    elif act_out == 'gelu':
        # TODO(synk): PyTorch nn.GELU defaults to exact erf-GELU; tanh approx is
        # used here for a TPU-friendly (EUP) lowering.
        y = jax.nn.gelu(y, approximate=True)
    o_ref[...] = y.astype(o_ref.dtype)


def linear(x, w, b, *, act_in=None, act_out=None, out_dtype=jnp.bfloat16):
    m, k = x.shape
    n = w.shape[1]
    bm = _row_block(m)
    bn = _col_block(n)
    kernel = functools.partial(_linear_kernel, act_in=act_in, act_out=act_out)
    return pl.pallas_call(
        kernel,
        out_shape=jax.ShapeDtypeStruct((m, n), out_dtype),
        grid_spec=pltpu.PrefetchScalarGridSpec(
            num_scalar_prefetch=0,
            grid=(pl.cdiv(m, bm), pl.cdiv(n, bn)),
            in_specs=[
                pl.BlockSpec((bm, k), lambda i, j: (i, 0)),
                pl.BlockSpec((k, bn), lambda i, j: (0, j)),
                pl.BlockSpec((1, bn), lambda i, j: (0, j)),
            ],
            out_specs=pl.BlockSpec((bm, bn), lambda i, j: (i, j)),
        ),
        compiler_params=pltpu.CompilerParams(
            dimension_semantics=("parallel", "arbitrary"),
            vmem_limit_bytes=_VMEM_LIMIT_BYTES),
    )(x, w, b)


# ---------------------------------------------------------------------------
# Fused adaLN + linear on the token stream:
#   y = act_out( (LN(x) * (1 + scale) + shift) @ W + b )
# x: (N, T, K), pro: (N, 2, K) = [shift; scale], W: (K, n).
# ---------------------------------------------------------------------------
def _ada_linear_kernel(x_ref, pro_ref, w_ref, b_ref, o_ref, *, act_out):
    x = x_ref[0].astype(jnp.float32)
    pro = pro_ref[0].astype(jnp.float32)
    h = _adaln(x, pro).astype(jnp.bfloat16)
    y = jnp.dot(h, w_ref[...].astype(jnp.bfloat16),
                preferred_element_type=jnp.float32)
    y = y + b_ref[...].astype(jnp.float32)
    if act_out == 'gelu':
        y = jax.nn.gelu(y, approximate=True)
    o_ref[0] = y.astype(o_ref.dtype)


def ada_linear(x, pro, w, b, *, act_out=None, out_dtype=jnp.bfloat16):
    n, t, k = x.shape
    ncol = w.shape[1]
    bt = _row_block(t)
    bn = _col_block(ncol)
    kernel = functools.partial(_ada_linear_kernel, act_out=act_out)
    return pl.pallas_call(
        kernel,
        out_shape=jax.ShapeDtypeStruct((n, t, ncol), out_dtype),
        grid_spec=pltpu.PrefetchScalarGridSpec(
            num_scalar_prefetch=0,
            # Column axis outermost so the weight block stays VMEM-resident
            # across all token tiles (Pallas skips re-DMA of unchanged blocks).
            grid=(pl.cdiv(ncol, bn), n, pl.cdiv(t, bt)),
            in_specs=[
                pl.BlockSpec((1, bt, k), lambda j, i, tt: (i, tt, 0)),
                pl.BlockSpec((1, 2, k), lambda j, i, tt: (i, 0, 0)),
                pl.BlockSpec((k, bn), lambda j, i, tt: (0, j)),
                pl.BlockSpec((1, bn), lambda j, i, tt: (0, j)),
            ],
            out_specs=pl.BlockSpec((1, bt, bn), lambda j, i, tt: (i, tt, j)),
        ),
        compiler_params=pltpu.CompilerParams(
            dimension_semantics=("arbitrary", "parallel", "parallel"),
            vmem_limit_bytes=_VMEM_LIMIT_BYTES),
    )(x, pro, w, b)


# ---------------------------------------------------------------------------
# Fused linear + gated residual:  out = res + gate * (x @ W + b)
# res is the residual stream (aliased in place).  gate: (N, 1, n).
# ---------------------------------------------------------------------------
def _gated_linear_kernel(x_ref, res_ref, gate_ref, w_ref, b_ref, o_ref):
    xb = x_ref[0].astype(jnp.bfloat16)
    y = jnp.dot(xb, w_ref[...].astype(jnp.bfloat16),
                preferred_element_type=jnp.float32)
    y = y + b_ref[...].astype(jnp.float32)
    res = res_ref[0].astype(jnp.float32)
    gate = gate_ref[0].astype(jnp.float32)
    o_ref[0] = (res + gate * y).astype(o_ref.dtype)


def gated_linear(x, res, gate, w, b):
    n, t, k = x.shape
    ncol = w.shape[1]
    bt = _row_block(t)
    bn = _col_block(ncol)
    return pl.pallas_call(
        _gated_linear_kernel,
        out_shape=jax.ShapeDtypeStruct((n, t, ncol), res.dtype),
        grid_spec=pltpu.PrefetchScalarGridSpec(
            num_scalar_prefetch=0,
            grid=(pl.cdiv(ncol, bn), n, pl.cdiv(t, bt)),
            in_specs=[
                pl.BlockSpec((1, bt, k), lambda j, i, tt: (i, tt, 0)),
                pl.BlockSpec((1, bt, bn), lambda j, i, tt: (i, tt, j)),
                pl.BlockSpec((1, 1, bn), lambda j, i, tt: (i, 0, j)),
                pl.BlockSpec((k, bn), lambda j, i, tt: (0, j)),
                pl.BlockSpec((1, bn), lambda j, i, tt: (0, j)),
            ],
            out_specs=pl.BlockSpec((1, bt, bn), lambda j, i, tt: (i, tt, j)),
        ),
        input_output_aliases={1: 0},     # residual stream updated in place
        compiler_params=pltpu.CompilerParams(
            dimension_semantics=("arbitrary", "parallel", "parallel"),
            vmem_limit_bytes=_VMEM_LIMIT_BYTES),
    )(x, res, gate, w, b)


# ---------------------------------------------------------------------------
# Fused adaLN + qkv projection.  Emits q/k/v as three (N, T, D) outputs so the
# attention kernel consumes them directly (no XLA head transposes).
# ---------------------------------------------------------------------------
def _qkv_kernel(x_ref, pro_ref, w_ref, b_ref, q_ref, k_ref, v_ref):
    x = x_ref[0].astype(jnp.float32)
    pro = pro_ref[0].astype(jnp.float32)
    h = _adaln(x, pro).astype(jnp.bfloat16)
    y = jnp.dot(h, w_ref[...].astype(jnp.bfloat16),
                preferred_element_type=jnp.float32)
    y = y + b_ref[...].astype(jnp.float32)
    d = q_ref.shape[-1]
    q_ref[0] = y[:, 0 * d:1 * d].astype(q_ref.dtype)
    k_ref[0] = y[:, 1 * d:2 * d].astype(k_ref.dtype)
    v_ref[0] = y[:, 2 * d:3 * d].astype(v_ref.dtype)


def qkv_linear(x, pro, w, b):
    n, t, d = x.shape
    bt = _row_block(t)
    io_spec = pl.BlockSpec((1, bt, d), lambda i, tt: (i, tt, 0))
    # TODO(synk): column-tile the (D, 3D) qkv weight if D grows beyond ~2k.
    return pl.pallas_call(
        _qkv_kernel,
        out_shape=(jax.ShapeDtypeStruct((n, t, d), jnp.bfloat16),
                   jax.ShapeDtypeStruct((n, t, d), jnp.bfloat16),
                   jax.ShapeDtypeStruct((n, t, d), jnp.bfloat16)),
        grid_spec=pltpu.PrefetchScalarGridSpec(
            num_scalar_prefetch=0,
            grid=(n, pl.cdiv(t, bt)),
            in_specs=[
                io_spec,
                pl.BlockSpec((1, 2, d), lambda i, tt: (i, 0, 0)),
                pl.BlockSpec((d, 3 * d), lambda i, tt: (0, 0)),
                pl.BlockSpec((1, 3 * d), lambda i, tt: (0, 0)),
            ],
            out_specs=[io_spec, io_spec, io_spec],
        ),
        compiler_params=pltpu.CompilerParams(
            dimension_semantics=("parallel", "parallel"),
            vmem_limit_bytes=_VMEM_LIMIT_BYTES),
    )(x, pro, w, b)


# ---------------------------------------------------------------------------
# Multi-head softmax attention on (N, T, D) q/k/v (heads are lane groups).
# Per-head (T, T) scores only; output written back in (N, T, D) layout.
# ---------------------------------------------------------------------------
def _mha_kernel(q_ref, k_ref, v_ref, o_ref, *, num_heads, head_dim):
    q = q_ref[0]
    k = k_ref[0]
    v = v_ref[0]
    outs = []
    for h in range(num_heads):           # static head loop: static lane slices
        sl = slice(h * head_dim, (h + 1) * head_dim)
        qh = q[:, sl].astype(jnp.bfloat16)
        kh = k[:, sl].astype(jnp.bfloat16)
        vh = v[:, sl].astype(jnp.bfloat16)
        # 1/sqrt(head_dim) is folded into the q projection weights.
        s = jax.lax.dot_general(qh, kh, (((1,), (1,)), ((), ())),
                                preferred_element_type=jnp.float32)   # (T, T)
        s = s - jnp.max(s, axis=-1, keepdims=True)
        p = jnp.exp(s)
        p = p * pl.reciprocal(jnp.sum(p, axis=-1, keepdims=True), approx=True)
        ctx = jnp.dot(p.astype(jnp.bfloat16), vh,
                      preferred_element_type=jnp.float32)
        outs.append(ctx.astype(o_ref.dtype))
    o_ref[0] = jnp.concatenate(outs, axis=-1)   # lane-dense full-width store


def mha(q, k, v, *, num_heads):
    n, t, d = q.shape
    head_dim = d // num_heads
    kernel = functools.partial(_mha_kernel, num_heads=num_heads, head_dim=head_dim)
    spec = pl.BlockSpec((1, t, d), lambda i: (i, 0, 0))
    # TODO(synk): switch to a KV-tiled online-softmax (flash) form for T >= ~2k.
    return pl.pallas_call(
        kernel,
        out_shape=jax.ShapeDtypeStruct((n, t, d), jnp.bfloat16),
        grid_spec=pltpu.PrefetchScalarGridSpec(
            num_scalar_prefetch=0,
            grid=(n,),
            in_specs=[spec, spec, spec],
            out_specs=spec,
        ),
        compiler_params=pltpu.CompilerParams(
            dimension_semantics=("parallel",),
            vmem_limit_bytes=_VMEM_LIMIT_BYTES),
    )(q, k, v)


# ---------------------------------------------------------------------------
# Parameter init (deterministic; shapes follow the PyTorch module __init__).
# Matmul weights stored in bf16 (MXU operand dtype), biases / embedding in f32.
# ---------------------------------------------------------------------------
def init_params(key, *, patch_size, in_channels, dim, depth, hidden_scale,
                num_classes, num_heads, freq_emb_dim=256):
    keys = iter(jax.random.split(key, 16 + 8 * depth))

    def xavier(shape):
        lim = math.sqrt(6.0 / (shape[0] + shape[1]))
        return jax.random.uniform(next(keys), shape, jnp.float32, -lim, lim)

    def normal(shape, std=0.02):
        return jax.random.normal(next(keys), shape, jnp.float32) * std

    def zeros(shape):
        return jnp.zeros(shape, jnp.float32)

    p, C, D = patch_size, in_channels, dim
    hidden = hidden_scale * dim
    head_dim = D // num_heads
    P = p * p * C
    P_pad = ((P + 127) // 128) * 128        # lane-dense final projection
    cond_cols = (6 * depth + 2) * D         # all block adaLN projs + final layer

    params = {
        # PatchEmbed: Conv2d(C, D, p, stride=p) == per-patch matmul.
        'patch_w': xavier((C * p * p, D)).astype(jnp.bfloat16),
        'patch_b': jnp.full((1, D), -1.0, jnp.float32),
        # TimeStepEmbedding MLP.
        't_mlp1_w': normal((freq_emb_dim, D)).astype(jnp.bfloat16),
        't_mlp1_b': zeros((1, D)),
        't_mlp2_w': normal((D, D)).astype(jnp.bfloat16),
        't_mlp2_b': zeros((1, D)),
        # ClassEmbedding.
        'c_embed': normal((num_classes, D)),
        'c_mlp_w': xavier((D, D)).astype(jnp.bfloat16),
        'c_mlp_b': zeros((1, D)),
        # All adaLN condition projections (blocks + final layer) hoisted into
        # one GEMM.  Random instead of the module's zero-init so the kernels
        # do non-trivial work.
        'cond_all_w': normal((D, cond_cols)).astype(jnp.bfloat16),
        'cond_all_b': zeros((1, cond_cols)),
        # FinalLayer out_proj (random instead of zero-init), lane-padded.
        'wout': jnp.pad(normal((D, P)), ((0, 0), (0, P_pad - P))).astype(jnp.bfloat16),
        'bout': zeros((1, P_pad)),
        'blocks': [],
    }
    qk_scale = 1.0 / math.sqrt(head_dim)
    for _ in range(depth):
        wqkv = xavier((D, 3 * D))
        wqkv = wqkv.at[:, :D].multiply(qk_scale)   # fold attention scale into q
        params['blocks'].append({
            'wqkv': wqkv.astype(jnp.bfloat16),
            'bqkv': zeros((1, 3 * D)),
            'wproj': xavier((D, D)).astype(jnp.bfloat16),
            'bproj': zeros((1, D)),
            'wfc1': xavier((D, hidden)).astype(jnp.bfloat16),
            'bfc1': zeros((1, hidden)),
            'wfc2': xavier((hidden, D)).astype(jnp.bfloat16),
            'bfc2': zeros((1, D)),
        })
    return params


# ---------------------------------------------------------------------------
# DiT forward
# ---------------------------------------------------------------------------
def dit_forward(params, x_t, t, c, *, patch_size, num_heads, drop_class=False,
                freq_emb_dim=256):
    N, C, H, W = x_t.shape
    p = patch_size
    Hp, Wp = H // p, W // p
    T = Hp * Wp
    D = params['patch_w'].shape[1]
    P = p * p * C
    depth = len(params['blocks'])

    # --- patch embedding: Conv2d(C, D, p, stride=p) == per-patch matmul ---
    patches = x_t.reshape(N, C, Hp, p, Wp, p)
    patches = patches.transpose(0, 2, 4, 1, 3, 5).reshape(N * T, C * p * p)
    x = linear(patches, params['patch_w'], params['patch_b']).reshape(N, T, D)

    # --- timestep embedding (sinusoidal features in XLA glue, MLP in Pallas) ---
    denom = 10000.0 ** (2.0 * jnp.arange(freq_emb_dim, dtype=jnp.float32)
                        / freq_emb_dim)
    emb = t[:, None] * denom[None, :]
    even = (jnp.arange(freq_emb_dim) % 2) == 0
    t_feat = jnp.where(even[None, :], jnp.sin(emb), jnp.cos(emb))
    t_emb = linear(t_feat, params['t_mlp1_w'], params['t_mlp1_b'], act_out='silu')
    t_emb = linear(t_emb, params['t_mlp2_w'], params['t_mlp2_b'])

    # --- class embedding (gather in XLA glue, MLP in Pallas) ---
    c_emb = linear(jnp.take(params['c_embed'], c, axis=0),
                   params['c_mlp_w'], params['c_mlp_b'])
    if drop_class:
        c_emb = jnp.zeros_like(c_emb)
    cond = c_emb + t_emb                                     # (N, D)

    # --- all adaLN condition projections in a single column-tiled GEMM ---
    mod_all = linear(cond, params['cond_all_w'], params['cond_all_b'],
                     act_in='silu', out_dtype=jnp.float32)
    mod_all = mod_all.reshape(N, 6 * depth + 2, D)           # lane-dense rows

    # --- transformer blocks ---
    for l, blk in enumerate(params['blocks']):
        m = mod_all[:, 6 * l:6 * l + 6]                      # (N, 6, D)
        pro_attn, gate_attn = m[:, 0:2], m[:, 2:3]
        pro_mlp,  gate_mlp = m[:, 3:5], m[:, 5:6]

        # attention branch (adaLN fused into qkv; gated residual fused into wproj)
        # TODO(synk): DiTBlock pos_encoding variant (e.g. RoPE) not specified;
        # this implements pos_encoding="none".
        q, k, v = qkv_linear(x, pro_attn, blk['wqkv'], blk['bqkv'])
        ctx = mha(q, k, v, num_heads=num_heads)              # (N, T, D)
        x = gated_linear(ctx, x, gate_attn, blk['wproj'], blk['bproj'])

        # MLP branch (adaLN fused into fc1; gated residual fused into fc2)
        h1 = ada_linear(x, pro_mlp, blk['wfc1'], blk['bfc1'], act_out='gelu')
        x = gated_linear(h1, x, gate_mlp, blk['wfc2'], blk['bfc2'])

    # --- final layer: fused adaLN + lane-dense padded projection ---
    pro_final = mod_all[:, 6 * depth:6 * depth + 2]
    out = ada_linear(x, pro_final, params['wout'], params['bout'],
                     out_dtype=jnp.float32)
    out = out[:, :, :P]

    # --- unpatchify: (N, T, p*p*C) -> (N, C, H, W) ---
    hh = ww = int(T ** 0.5)
    out = out.reshape(N, hh, ww, p, p, C)
    out = jnp.einsum('nhwpqc->nchpwq', out)
    return out.reshape(N, C, hh * p, ww * p)


if __name__ == "__main__":
    # Small, module-consistent shapes
    input_size, patch_size, in_channels = 16, 4, 4
    dim, depth, num_heads, hidden_scale = 32, 2, 4, 4
    num_classes = 10
    N = 2

    key = jax.random.PRNGKey(0)
    k_params, k_x, k_t, k_c = jax.random.split(key, 4)

    params = init_params(k_params, patch_size=patch_size, in_channels=in_channels,
                         dim=dim, depth=depth, hidden_scale=hidden_scale,
                         num_classes=num_classes, num_heads=num_heads)

    x_t = jax.random.normal(k_x, (N, in_channels, input_size, input_size),
                            jnp.float32)
    t = jax.random.uniform(k_t, (N,), jnp.float32)
    c = jax.random.randint(k_c, (N,), 0, num_classes)

    fwd = jax.jit(functools.partial(dit_forward, patch_size=patch_size,
                                    num_heads=num_heads))
    out = fwd(params, x_t, t, c)
    jax.block_until_ready(out)
    assert out.shape == (N, in_channels, input_size, input_size)
    assert bool(jnp.all(jnp.isfinite(out)))
    print("KERNEL_OK")
</pallas_src>

<mosaic_0001>
module attributes {stable_mosaic.version = 11 : i64} {
  func.func @_linear_kernel(%arg0: i32, %arg1: i32, %arg2: memref<32x64xf32, #tpu.memory_space<vmem>>, %arg3: memref<64x32xbf16, #tpu.memory_space<vmem>>, %arg4: memref<1x32xf32, #tpu.memory_space<vmem>>, %arg5: memref<32x32xbf16, #tpu.memory_space<vmem>>) attributes {dimension_semantics = [#tpu.dimension_semantics<parallel>, #tpu.dimension_semantics<arbitrary>], iteration_bounds = array<i64: 1, 1>, scalar_prefetch = 0 : i64, scratch_operands = 0 : i64, tpu.core_type = #tpu.core_type<tc>, window_params = [{transform_indices = @transform_0, window_bounds = array<i64: 32, 64>}, {transform_indices = @transform_1, window_bounds = array<i64: 64, 32>}, {transform_indices = @transform_2, window_bounds = array<i64: 1, 32>}, {transform_indices = @transform_3, window_bounds = array<i64: 32, 32>}]} {
    %c0 = arith.constant 0 : index
    %c0_0 = arith.constant 0 : index
    %0 = vector.load %arg2[%c0, %c0_0] : memref<32x64xf32, #tpu.memory_space<vmem>>, vector<32x64xf32>
    %1 = arith.truncf %0 : vector<32x64xf32> to vector<32x64xbf16>
    %c0_1 = arith.constant 0 : index
    %c0_2 = arith.constant 0 : index
    %2 = vector.load %arg3[%c0_1, %c0_2] : memref<64x32xbf16, #tpu.memory_space<vmem>>, vector<64x32xbf16>
    %cst = arith.constant dense<0.000000e+00> : vector<32x32xf32>
    %3 = tpu.matmul %1, %2, %cst {dimension_numbers = #tpu.dot_dimension_numbers<[1], [0], [0], [1], [0, 0, 1, 1], [], []>} : vector<32x64xbf16>, vector<64x32xbf16>, vector<32x32xf32> -> vector<32x32xf32>
    %c0_3 = arith.constant 0 : index
    %c0_4 = arith.constant 0 : index
    %4 = vector.load %arg4[%c0_3, %c0_4] : memref<1x32xf32, #tpu.memory_space<vmem>>, vector<1x32xf32>
    %5 = vector.broadcast %4 : vector<1x32xf32> to vector<32x32xf32>
    %6 = arith.addf %3, %5 : vector<32x32xf32>
    %7 = arith.truncf %6 : vector<32x32xf32> to vector<32x32xbf16>
    %c0_5 = arith.constant 0 : index
    %c0_6 = arith.constant 0 : index
    %8 = vector.load %arg5[%c0_5, %c0_6] : memref<32x32xbf16, #tpu.memory_space<vmem>>, vector<32x32xbf16>
    tpu.vector_store %arg5[%c0_5, %c0_6], %7 {strides = array<i32>} : memref<32x32xbf16, #tpu.memory_space<vmem>>, vector<32x32xbf16>,
    return
  }
  func.func @transform_0(%arg0: i32, %arg1: i32) -> (i32, i32) {
    %c0_i32 = arith.constant 0 : i32
    %c0_i32_0 = arith.constant 0 : i32
    return %arg0, %c0_i32 : i32, i32
  }
  func.func @transform_1(%arg0: i32, %arg1: i32) -> (i32, i32) {
    %c0_i32 = arith.constant 0 : i32
    %c0_i32_0 = arith.constant 0 : i32
    return %c0_i32, %arg1 : i32, i32
  }
  func.func @transform_2(%arg0: i32, %arg1: i32) -> (i32, i32) {
    %c0_i32 = arith.constant 0 : i32
    %c0_i32_0 = arith.constant 0 : i32
    return %c0_i32, %arg1 : i32, i32
  }
  func.func @transform_3(%arg0: i32, %arg1: i32) -> (i32, i32) {
    %c0_i32 = arith.constant 0 : i32
    return %arg0, %arg1 : i32, i32
  }
}

module attributes {stable_mosaic.version = 11 : i64} {
  func.func @_linear_kernel(%arg0: i32, %arg1: i32, %arg2: memref<2x32xf32, #tpu.memory_space<vmem>>, %arg3: memref<32x32xbf16, #tpu.memory_space<vmem>>, %arg4: memref<1x32xf32, #tpu.memory_space<vmem>>, %arg5: memref<2x32xbf16, #tpu.memory_space<vmem>>) attributes {dimension_semantics = [#tpu.dimension_semantics<parallel>, #tpu.dimension_semantics<arbitrary>], iteration_bounds = array<i64: 1, 1>, scalar_prefetch = 0 : i64, scratch_operands = 0 : i64, tpu.core_type = #tpu.core_type<tc>, window_params = [{transform_indices = @transform_0, window_bounds = array<i64: 2, 32>}, {transform_indices = @transform_1, window_bounds = array<i64: 32, 32>}, {transform_indices = @transform_2, window_bounds = array<i64: 1, 32>}, {transform_indices = @transform_3, window_bounds = array<i64: 2, 32>}]} {
    %c0 = arith.constant 0 : index
    %c0_0 = arith.constant 0 : index
    %0 = vector.load %arg2[%c0, %c0_0] : memref<2x32xf32, #tpu.memory_space<vmem>>, vector<2x32xf32>
    %1 = arith.truncf %0 : vector<2x32xf32> to vector<2x32xbf16>
    %c0_1 = arith.constant 0 : index
    %c0_2 = arith.constant 0 : index
    %2 = vector.load %arg3[%c0_1, %c0_2] : memref<32x32xbf16, #tpu.memory_space<vmem>>, vector<32x32xbf16>
    %cst = arith.constant dense<0.000000e+00> : vector<2x32xf32>
    %3 = tpu.matmul %1, %2, %cst {dimension_numbers = #tpu.dot_dimension_numbers<[1], [0], [0], [1], [0, 0, 1, 1], [], []>} : vector<2x32xbf16>, vector<32x32xbf16>, vector<2x32xf32> -> vector<2x32xf32>
    %c0_3 = arith.constant 0 : index
    %c0_4 = arith.constant 0 : index
    %4 = vector.load %arg4[%c0_3, %c0_4] : memref<1x32xf32, #tpu.memory_space<vmem>>, vector<1x32xf32>
    %5 = vector.broadcast %4 : vector<1x32xf32> to vector<2x32xf32>
    %6 = arith.addf %3, %5 : vector<2x32xf32>
    %7 = arith.truncf %6 : vector<2x32xf32> to vector<2x32xbf16>
    %c0_5 = arith.constant 0 : index
    %c0_6 = arith.constant 0 : index
    %8 = vector.load %arg5[%c0_5, %c0_6] : memref<2x32xbf16, #tpu.memory_space<vmem>>, vector<2x32xbf16>
    tpu.vector_store %arg5[%c0_5, %c0_6], %7 {strides = array<i32>} : memref<2x32xbf16, #tpu.memory_space<vmem>>, vector<2x32xbf16>,
    return
  }
  func.func @transform_0(%arg0: i32, %arg1: i32) -> (i32, i32) {
    %c0_i32 = arith.constant 0 : i32
    %c0_i32_0 = arith.constant 0 : i32
    return %arg0, %c0_i32 : i32, i32
  }
  func.func @transform_1(%arg0: i32, %arg1: i32) -> (i32, i32) {
    %c0_i32 = arith.constant 0 : i32
    %c0_i32_0 = arith.constant 0 : i32
    return %c0_i32, %arg1 : i32, i32
  }
  func.func @transform_2(%arg0: i32, %arg1: i32) -> (i32, i32) {
    %c0_i32 = arith.constant 0 : i32
    %c0_i32_0 = arith.constant 0 : i32
    return %c0_i32, %arg1 : i32, i32
  }
  func.func @transform_3(%arg0: i32, %arg1: i32) -> (i32, i32) {
    %c0_i32 = arith.constant 0 : i32
    return %arg0, %arg1 : i32, i32
  }
}

module attributes {stable_mosaic.version = 11 : i64} {
  func.func @_linear_kernel(%arg0: i32, %arg1: i32, %arg2: memref<2x256xf32, #tpu.memory_space<vmem>>, %arg3: memref<256x32xbf16, #tpu.memory_space<vmem>>, %arg4: memref<1x32xf32, #tpu.memory_space<vmem>>, %arg5: memref<2x32xbf16, #tpu.memory_space<vmem>>) attributes {dimension_semantics = [#tpu.dimension_semantics<parallel>, #tpu.dimension_semantics<arbitrary>], iteration_bounds = array<i64: 1, 1>, scalar_prefetch = 0 : i64, scratch_operands = 0 : i64, tpu.core_type = #tpu.core_type<tc>, window_params = [{transform_indices = @transform_0, window_bounds = array<i64: 2, 256>}, {transform_indices = @transform_1, window_bounds = array<i64: 256, 32>}, {transform_indices = @transform_2, window_bounds = array<i64: 1, 32>}, {transform_indices = @transform_3, window_bounds = array<i64: 2, 32>}]} {
    %c0 = arith.constant 0 : index
    %c0_0 = arith.constant 0 : index
    %0 = vector.load %arg2[%c0, %c0_0] : memref<2x256xf32, #tpu.memory_space<vmem>>, vector<2x256xf32>
    %1 = arith.truncf %0 : vector<2x256xf32> to vector<2x256xbf16>
    %c0_1 = arith.constant 0 : index
    %c0_2 = arith.constant 0 : index
    %2 = vector.load %arg3[%c0_1, %c0_2] : memref<256x32xbf16, #tpu.memory_space<vmem>>, vector<256x32xbf16>
    %cst = arith.constant dense<0.000000e+00> : vector<2x32xf32>
    %3 = tpu.matmul %1, %2, %cst {dimension_numbers = #tpu.dot_dimension_numbers<[1], [0], [0], [1], [0, 0, 1, 1], [], []>} : vector<2x256xbf16>, vector<256x32xbf16>, vector<2x32xf32> -> vector<2x32xf32>
    %c0_3 = arith.constant 0 : index
    %c0_4 = arith.constant 0 : index
    %4 = vector.load %arg4[%c0_3, %c0_4] : memref<1x32xf32, #tpu.memory_space<vmem>>, vector<1x32xf32>
    %5 = vector.broadcast %4 : vector<1x32xf32> to vector<2x32xf32>
    %6 = arith.addf %3, %5 : vector<2x32xf32>
    %7 = arith.negf %6 : vector<2x32xf32>
    %8 = math.exp %7 : vector<2x32xf32>
    %cst_5 = arith.constant 1.000000e+00 : f32
    %9 = vector.broadcast %cst_5 : f32 to vector<2x32xf32>
    %10 = arith.addf %9, %8 : vector<2x32xf32>
    %11 = arith.divf %9, %10 : vector<2x32xf32>
    %12 = arith.mulf %6, %11 : vector<2x32xf32>
    %13 = arith.truncf %12 : vector<2x32xf32> to vector<2x32xbf16>
    %c0_6 = arith.constant 0 : index
    %c0_7 = arith.constant 0 : index
    %14 = vector.load %arg5[%c0_6, %c0_7] : memref<2x32xbf16, #tpu.memory_space<vmem>>, vector<2x32xbf16>
    tpu.vector_store %arg5[%c0_6, %c0_7], %13 {strides = array<i32>} : memref<2x32xbf16, #tpu.memory_space<vmem>>, vector<2x32xbf16>,
    return
  }
  func.func @transform_0(%arg0: i32, %arg1: i32) -> (i32, i32) {
    %c0_i32 = arith.constant 0 : i32
    %c0_i32_0 = arith.constant 0 : i32
    return %arg0, %c0_i32 : i32, i32
  }
  func.func @transform_1(%arg0: i32, %arg1: i32) -> (i32, i32) {
    %c0_i32 = arith.constant 0 : i32
    %c0_i32_0 = arith.constant 0 : i32
    return %c0_i32, %arg1 : i32, i32
  }
  func.func @transform_2(%arg0: i32, %arg1: i32) -> (i32, i32) {
    %c0_i32 = arith.constant 0 : i32
    %c0_i32_0 = arith.constant 0 : i32
    return %c0_i32, %arg1 : i32, i32
  }
  func.func @transform_3(%arg0: i32, %arg1: i32) -> (i32, i32) {
    %c0_i32 = arith.constant 0 : i32
    return %arg0, %arg1 : i32, i32
  }
}

module attributes {stable_mosaic.version = 11 : i64} {
  func.func @_linear_kernel(%arg0: i32, %arg1: i32, %arg2: memref<2x32xbf16, #tpu.memory_space<vmem>>, %arg3: memref<32x32xbf16, #tpu.memory_space<vmem>>, %arg4: memref<1x32xf32, #tpu.memory_space<vmem>>, %arg5: memref<2x32xbf16, #tpu.memory_space<vmem>>) attributes {dimension_semantics = [#tpu.dimension_semantics<parallel>, #tpu.dimension_semantics<arbitrary>], iteration_bounds = array<i64: 1, 1>, scalar_prefetch = 0 : i64, scratch_operands = 0 : i64, tpu.core_type = #tpu.core_type<tc>, window_params = [{transform_indices = @transform_0, window_bounds = array<i64: 2, 32>}, {transform_indices = @transform_1, window_bounds = array<i64: 32, 32>}, {transform_indices = @transform_2, window_bounds = array<i64: 1, 32>}, {transform_indices = @transform_3, window_bounds = array<i64: 2, 32>}]} {
    %c0 = arith.constant 0 : index
    %c0_0 = arith.constant 0 : index
    %0 = vector.load %arg2[%c0, %c0_0] : memref<2x32xbf16, #tpu.memory_space<vmem>>, vector<2x32xbf16>
    %c0_1 = arith.constant 0 : index
    %c0_2 = arith.constant 0 : index
    %1 = vector.load %arg3[%c0_1, %c0_2] : memref<32x32xbf16, #tpu.memory_space<vmem>>, vector<32x32xbf16>
    %cst = arith.constant dense<0.000000e+00> : vector<2x32xf32>
    %2 = tpu.matmul %0, %1, %cst {dimension_numbers = #tpu.dot_dimension_numbers<[1], [0], [0], [1], [0, 0, 1, 1], [], []>} : vector<2x32xbf16>, vector<32x32xbf16>, vector<2x32xf32> -> vector<2x32xf32>
    %c0_3 = arith.constant 0 : index
    %c0_4 = arith.constant 0 : index
    %3 = vector.load %arg4[%c0_3, %c0_4] : memref<1x32xf32, #tpu.memory_space<vmem>>, vector<1x32xf32>
    %4 = vector.broadcast %3 : vector<1x32xf32> to vector<2x32xf32>
    %5 = arith.addf %2, %4 : vector<2x32xf32>
    %6 = arith.truncf %5 : vector<2x32xf32> to vector<2x32xbf16>
    %c0_5 = arith.constant 0 : index
    %c0_6 = arith.constant 0 : index
    %7 = vector.load %arg5[%c0_5, %c0_6] : memref<2x32xbf16, #tpu.memory_space<vmem>>, vector<2x32xbf16>
    tpu.vector_store %arg5[%c0_5, %c0_6], %6 {strides = array<i32>} : memref<2x32xbf16, #tpu.memory_space<vmem>>, vector<2x32xbf16>,
    return
  }
  func.func @transform_0(%arg0: i32, %arg1: i32) -> (i32, i32) {
    %c0_i32 = arith.constant 0 : i32
    %c0_i32_0 = arith.constant 0 : i32
    return %arg0, %c0_i32 : i32, i32
  }
  func.func @transform_1(%arg0: i32, %arg1: i32) -> (i32, i32) {
    %c0_i32 = arith.constant 0 : i32
    %c0_i32_0 = arith.constant 0 : i32
    return %c0_i32, %arg1 : i32, i32
  }
  func.func @transform_2(%arg0: i32, %arg1: i32) -> (i32, i32) {
    %c0_i32 = arith.constant 0 : i32
    %c0_i32_0 = arith.constant 0 : i32
    return %c0_i32, %arg1 : i32, i32
  }
  func.func @transform_3(%arg0: i32, %arg1: i32) -> (i32, i32) {
    %c0_i32 = arith.constant 0 : i32
    return %arg0, %arg1 : i32, i32
  }
}

module attributes {stable_mosaic.version = 11 : i64} {
  func.func @_linear_kernel(%arg0: i32, %arg1: i32, %arg2: memref<2x32xbf16, #tpu.memory_space<vmem>>, %arg3: memref<32x448xbf16, #tpu.memory_space<vmem>>, %arg4: memref<1x448xf32, #tpu.memory_space<vmem>>, %arg5: memref<2x448xf32, #tpu.memory_space<vmem>>) attributes {dimension_semantics = [#tpu.dimension_semantics<parallel>, #tpu.dimension_semantics<arbitrary>], iteration_bounds = array<i64: 1, 1>, scalar_prefetch = 0 : i64, scratch_operands = 0 : i64, tpu.core_type = #tpu.core_type<tc>, window_params = [{transform_indices = @transform_0, window_bounds = array<i64: 2, 32>}, {transform_indices = @transform_1, window_bounds = array<i64: 32, 448>}, {transform_indices = @transform_2, window_bounds = array<i64: 1, 448>}, {transform_indices = @transform_3, window_bounds = array<i64: 2, 448>}]} {
    %c0 = arith.constant 0 : index
    %c0_0 = arith.constant 0 : index
    %0 = vector.load %arg2[%c0, %c0_0] : memref<2x32xbf16, #tpu.memory_space<vmem>>, vector<2x32xbf16>
    %1 = arith.extf %0 : vector<2x32xbf16> to vector<2x32xf32>
    %2 = arith.negf %1 : vector<2x32xf32>
    %3 = math.exp %2 : vector<2x32xf32>
    %cst = arith.constant 1.000000e+00 : f32
    %4 = vector.broadcast %cst : f32 to vector<2x32xf32>
    %5 = arith.addf %4, %3 : vector<2x32xf32>
    %6 = arith.divf %4, %5 : vector<2x32xf32>
    %7 = arith.mulf %1, %6 : vector<2x32xf32>
    %8 = arith.truncf %7 : vector<2x32xf32> to vector<2x32xbf16>
    %c0_1 = arith.constant 0 : index
    %c0_2 = arith.constant 0 : index
    %9 = vector.load %arg3[%c0_1, %c0_2] : memref<32x448xbf16, #tpu.memory_space<vmem>>, vector<32x448xbf16>
    %cst_3 = arith.constant dense<0.000000e+00> : vector<2x448xf32>
    %10 = tpu.matmul %8, %9, %cst_3 {dimension_numbers = #tpu.dot_dimension_numbers<[1], [0], [0], [1], [0, 0, 1, 1], [], []>} : vector<2x32xbf16>, vector<32x448xbf16>, vector<2x448xf32> -> vector<2x448xf32>
    %c0_4 = arith.constant 0 : index
    %c0_5 = arith.constant 0 : index
    %11 = vector.load %arg4[%c0_4, %c0_5] : memref<1x448xf32, #tpu.memory_space<vmem>>, vector<1x448xf32>
    %12 = vector.broadcast %11 : vector<1x448xf32> to vector<2x448xf32>
    %13 = arith.addf %10, %12 : vector<2x448xf32>
    %c0_6 = arith.constant 0 : index
    %c0_7 = arith.constant 0 : index
    %14 = vector.load %arg5[%c0_6, %c0_7] : memref<2x448xf32, #tpu.memory_space<vmem>>, vector<2x448xf32>
    tpu.vector_store %arg5[%c0_6, %c0_7], %13 {strides = array<i32>} : memref<2x448xf32, #tpu.memory_space<vmem>>, vector<2x448xf32>,
    return
  }
  func.func @transform_0(%arg0: i32, %arg1: i32) -> (i32, i32) {
    %c0_i32 = arith.constant 0 : i32
    %c0_i32_0 = arith.constant 0 : i32
    return %arg0, %c0_i32 : i32, i32
  }
  func.func @transform_1(%arg0: i32, %arg1: i32) -> (i32, i32) {
    %c0_i32 = arith.constant 0 : i32
    %c0_i32_0 = arith.constant 0 : i32
    return %c0_i32, %arg1 : i32, i32
  }
  func.func @transform_2(%arg0: i32, %arg1: i32) -> (i32, i32) {
    %c0_i32 = arith.constant 0 : i32
    %c0_i32_0 = arith.constant 0 : i32
    return %c0_i32, %arg1 : i32, i32
  }
  func.func @transform_3(%arg0: i32, %arg1: i32) -> (i32, i32) {
    %c0_i32 = arith.constant 0 : i32
    return %arg0, %arg1 : i32, i32
  }
}

module attributes {stable_mosaic.version = 11 : i64} {
  func.func @_qkv_kernel(%arg0: i32, %arg1: i32, %arg2: memref<1x16x32xbf16, #tpu.memory_space<vmem>>, %arg3: memref<1x2x32xf32, #tpu.memory_space<vmem>>, %arg4: memref<32x96xbf16, #tpu.memory_space<vmem>>, %arg5: memref<1x96xf32, #tpu.memory_space<vmem>>, %arg6: memref<1x16x32xbf16, #tpu.memory_space<vmem>>, %arg7: memref<1x16x32xbf16, #tpu.memory_space<vmem>>, %arg8: memref<1x16x32xbf16, #tpu.memory_space<vmem>>) attributes {dimension_semantics = [#tpu.dimension_semantics<parallel>, #tpu.dimension_semantics<parallel>], iteration_bounds = array<i64: 2, 1>, scalar_prefetch = 0 : i64, scratch_operands = 0 : i64, tpu.core_type = #tpu.core_type<tc>, window_params = [{transform_indices = @transform_0, window_bounds = array<i64: 1, 16, 32>}, {transform_indices = @transform_1, window_bounds = array<i64: 1, 2, 32>}, {pipeline_mode = #tpu.pipeline_mode<synchronous>, transform_indices = @transform_2, window_bounds = array<i64: 32, 96>}, {pipeline_mode = #tpu.pipeline_mode<synchronous>, transform_indices = @transform_3, window_bounds = array<i64: 1, 96>}, {transform_indices = @transform_4, window_bounds = array<i64: 1, 16, 32>}, {transform_indices = @transform_5, window_bounds = array<i64: 1, 16, 32>}, {transform_indices = @transform_6, window_bounds = array<i64: 1, 16, 32>}]} {
    %c0 = arith.constant 0 : index
    %c0_0 = arith.constant 0 : index
    %c0_1 = arith.constant 0 : index
    %0 = vector.load %arg2[%c0, %c0_0, %c0_1] : memref<1x16x32xbf16, #tpu.memory_space<vmem>>, vector<1x16x32xbf16>
    %1 = vector.shape_cast %0 : vector<1x16x32xbf16> to vector<16x32xbf16>
    %2 = arith.extf %1 : vector<16x32xbf16> to vector<16x32xf32>
    %c0_2 = arith.constant 0 : index
    %c0_3 = arith.constant 0 : index
    %c0_4 = arith.constant 0 : index
    %3 = vector.load %arg3[%c0_2, %c0_3, %c0_4] : memref<1x2x32xf32, #tpu.memory_space<vmem>>, vector<1x2x32xf32>
    %4 = vector.shape_cast %3 : vector<1x2x32xf32> to vector<2x32xf32>
    %5 = vector.extract_strided_slice %4 {offsets = [0, 0], sizes = [1, 32], strides = [1, 1]} : vector<2x32xf32> to vector<1x32xf32>
    %6 = vector.extract_strided_slice %4 {offsets = [1, 0], sizes = [1, 32], strides = [1, 1]} : vector<2x32xf32> to vector<1x32xf32>
    %cst = arith.constant dense<0.000000e+00> : vector<16xf32>
    %7 = vector.multi_reduction <add>, %2, %cst [1] : vector<16x32xf32> to vector<16xf32>
    %8 = vector.shape_cast %7 : vector<16xf32> to vector<16x1xf32>
    %cst_5 = arith.constant 3.200000e+01 : f32
    %9 = vector.broadcast %cst_5 : f32 to vector<16x1xf32>
    %10 = arith.divf %8, %9 : vector<16x1xf32>
    %11 = vector.broadcast %10 : vector<16x1xf32> to vector<16x32xf32>
    %12 = arith.subf %2, %11 : vector<16x32xf32>
    %13 = arith.mulf %12, %12 : vector<16x32xf32>
    %cst_6 = arith.constant dense<0.000000e+00> : vector<16xf32>
    %14 = vector.multi_reduction <add>, %13, %cst_6 [1] : vector<16x32xf32> to vector<16xf32>
    %15 = vector.shape_cast %14 : vector<16xf32> to vector<16x1xf32>
    %cst_7 = arith.constant 3.200000e+01 : f32
    %16 = vector.broadcast %cst_7 : f32 to vector<16x1xf32>
    %17 = arith.divf %15, %16 : vector<16x1xf32>
    %18 = vector.broadcast %10 : vector<16x1xf32> to vector<16x32xf32>
    %19 = arith.subf %2, %18 : vector<16x32xf32>
    %cst_8 = arith.constant 9.99999997E-7 : f32
    %20 = vector.broadcast %cst_8 : f32 to vector<16x1xf32>
    %21 = arith.addf %17, %20 : vector<16x1xf32>
    %22 = math.rsqrt %21 : vector<16x1xf32>
    %23 = vector.broadcast %22 : vector<16x1xf32> to vector<16x32xf32>
    %24 = arith.mulf %19, %23 : vector<16x32xf32>
    %cst_9 = arith.constant 1.000000e+00 : f32
    %25 = vector.broadcast %cst_9 : f32 to vector<1x32xf32>
    %26 = arith.addf %25, %6 : vector<1x32xf32>
    %27 = vector.broadcast %26 : vector<1x32xf32> to vector<16x32xf32>
    %28 = arith.mulf %24, %27 : vector<16x32xf32>
    %29 = vector.broadcast %5 : vector<1x32xf32> to vector<16x32xf32>
    %30 = arith.addf %28, %29 : vector<16x32xf32>
    %31 = arith.truncf %30 : vector<16x32xf32> to vector<16x32xbf16>
    %c0_10 = arith.constant 0 : index
    %c0_11 = arith.constant 0 : index
    %32 = vector.load %arg4[%c0_10, %c0_11] : memref<32x96xbf16, #tpu.memory_space<vmem>>, vector<32x96xbf16>
    %cst_12 = arith.constant dense<0.000000e+00> : vector<16x96xf32>
    %33 = tpu.matmul %31, %32, %cst_12 {dimension_numbers = #tpu.dot_dimension_numbers<[1], [0], [0], [1], [0, 0, 1, 1], [], []>} : vector<16x32xbf16>, vector<32x96xbf16>, vector<16x96xf32> -> vector<16x96xf32>
    %c0_13 = arith.constant 0 : index
    %c0_14 = arith.constant 0 : index
    %34 = vector.load %arg5[%c0_13, %c0_14] : memref<1x96xf32, #tpu.memory_space<vmem>>, vector<1x96xf32>
    %35 = vector.broadcast %34 : vector<1x96xf32> to vector<16x96xf32>
    %36 = arith.addf %33, %35 : vector<16x96xf32>
    %37 = vector.extract_strided_slice %36 {offsets = [0, 0], sizes = [16, 32], strides = [1, 1]} : vector<16x96xf32> to vector<16x32xf32>
    %38 = arith.truncf %37 : vector<16x32xf32> to vector<16x32xbf16>
    %c0_15 = arith.constant 0 : index
    %c0_16 = arith.constant 0 : index
    %c0_17 = arith.constant 0 : index
    %39 = vector.load %arg6[%c0_15, %c0_16, %c0_17] : memref<1x16x32xbf16, #tpu.memory_space<vmem>>, vector<1x16x32xbf16>
    %40 = vector.shape_cast %39 : vector<1x16x32xbf16> to vector<16x32xbf16>
    %41 = vector.shape_cast %38 : vector<16x32xbf16> to vector<1x16x32xbf16>
    tpu.vector_store %arg6[%c0_15, %c0_16, %c0_17], %41 {strides = array<i32>} : memref<1x16x32xbf16, #tpu.memory_space<vmem>>, vector<1x16x32xbf16>,
    %42 = vector.extract_strided_slice %36 {offsets = [0, 32], sizes = [16, 32], strides = [1, 1]} : vector<16x96xf32> to vector<16x32xf32>
    %43 = arith.truncf %42 : vector<16x32xf32> to vector<16x32xbf16>
    %c0_18 = arith.constant 0 : index
    %c0_19 = arith.constant 0 : index
    %c0_20 = arith.constant 0 : index
    %44 = vector.load %arg7[%c0_18, %c0_19, %c0_20] : memref<1x16x32xbf16, #tpu.memory_space<vmem>>, vector<1x16x32xbf16>
    %45 = vector.shape_cast %44 : vector<1x16x32xbf16> to vector<16x32xbf16>
    %46 = vector.shape_cast %43 : vector<16x32xbf16> to vector<1x16x32xbf16>
    tpu.vector_store %arg7[%c0_18, %c0_19, %c0_20], %46 {strides = array<i32>} : memref<1x16x32xbf16, #tpu.memory_space<vmem>>, vector<1x16x32xbf16>,
    %47 = vector.extract_strided_slice %36 {offsets = [0, 64], sizes = [16, 32], strides = [1, 1]} : vector<16x96xf32> to vector<16x32xf32>
    %48 = arith.truncf %47 : vector<16x32xf32> to vector<16x32xbf16>
    %c0_21 = arith.constant 0 : index
    %c0_22 = arith.constant 0 : index
    %c0_23 = arith.constant 0 : index
    %49 = vector.load %arg8[%c0_21, %c0_22, %c0_23] : memref<1x16x32xbf16, #tpu.memory_space<vmem>>, vector<1x16x32xbf16>
    %50 = vector.shape_cast %49 : vector<1x16x32xbf16> to vector<16x32xbf16>
    %51 = vector.shape_cast %48 : vector<16x32xbf16> to vector<1x16x32xbf16>
    tpu.vector_store %arg8[%c0_21, %c0_22, %c0_23], %51 {strides = array<i32>} : memref<1x16x32xbf16, #tpu.memory_space<vmem>>, vector<1x16x32xbf16>,
    return
  }
  func.func @transform_0(%arg0: i32, %arg1: i32) -> (i32, i32, i32) {
    %c0_i32 = arith.constant 0 : i32
    %c0_i32_0 = arith.constant 0 : i32
    return %arg0, %arg1, %c0_i32 : i32, i32, i32
  }
  func.func @transform_1(%arg0: i32, %arg1: i32) -> (i32, i32, i32) {
    %c0_i32 = arith.constant 0 : i32
    %c0_i32_0 = arith.constant 0 : i32
    %c0_i32_1 = arith.constant 0 : i32
    return %arg0, %c0_i32, %c0_i32_0 : i32, i32, i32
  }
  func.func @transform_2(%arg0: i32, %arg1: i32) -> (i32, i32) {
    %c0_i32 = arith.constant 0 : i32
    %c0_i32_0 = arith.constant 0 : i32
    %c0_i32_1 = arith.constant 0 : i32
    return %c0_i32, %c0_i32_0 : i32, i32
  }
  func.func @transform_3(%arg0: i32, %arg1: i32) -> (i32, i32) {
    %c0_i32 = arith.constant 0 : i32
    %c0_i32_0 = arith.constant 0 : i32
    %c0_i32_1 = arith.constant 0 : i32
    return %c0_i32, %c0_i32_0 : i32, i32
  }
  func.func @transform_4(%arg0: i32, %arg1: i32) -> (i32, i32, i32) {
    %c0_i32 = arith.constant 0 : i32
    %c0_i32_0 = arith.constant 0 : i32
    return %arg0, %arg1, %c0_i32 : i32, i32, i32
  }
  func.func @transform_5(%arg0: i32, %arg1: i32) -> (i32, i32, i32) {
    %c0_i32 = arith.constant 0 : i32
    %c0_i32_0 = arith.constant 0 : i32
    return %arg0, %arg1, %c0_i32 : i32, i32, i32
  }
  func.func @transform_6(%arg0: i32, %arg1: i32) -> (i32, i32, i32) {
    %c0_i32 = arith.constant 0 : i32
    %c0_i32_0 = arith.constant 0 : i32
    return %arg0, %arg1, %c0_i32 : i32, i32, i32
  }
}

module attributes {stable_mosaic.version = 11 : i64} {
  func.func @_gated_linear_kernel(%arg0: i32, %arg1: i32, %arg2: i32, %arg3: memref<1x16x32xbf16, #tpu.memory_space<vmem>>, %arg4: memref<1x16x32xbf16, #tpu.memory_space<vmem>>, %arg5: memref<1x1x32xf32, #tpu.memory_space<vmem>>, %arg6: memref<32x32xbf16, #tpu.memory_space<vmem>>, %arg7: memref<1x32xf32, #tpu.memory_space<vmem>>, %arg8: memref<1x16x32xbf16, #tpu.memory_space<vmem>>) attributes {dimension_semantics = [#tpu.dimension_semantics<arbitrary>, #tpu.dimension_semantics<parallel>, #tpu.dimension_semantics<parallel>], iteration_bounds = array<i64: 1, 2, 1>, scalar_prefetch = 0 : i64, scratch_operands = 0 : i64, tpu.core_type = #tpu.core_type<tc>, window_params = [{transform_indices = @transform_0, window_bounds = array<i64: 1, 16, 32>}, {transform_indices = @transform_1, window_bounds = array<i64: 1, 16, 32>}, {transform_indices = @transform_2, window_bounds = array<i64: 1, 1, 32>}, {transform_indices = @transform_3, window_bounds = array<i64: 32, 32>}, {transform_indices = @transform_4, window_bounds = array<i64: 1, 32>}, {transform_indices = @transform_5, window_bounds = array<i64: 1, 16, 32>}]} {
    %c0 = arith.constant 0 : index
    %c0_0 = arith.constant 0 : index
    %c0_1 = arith.constant 0 : index
    %0 = vector.load %arg3[%c0, %c0_0, %c0_1] : memref<1x16x32xbf16, #tpu.memory_space<vmem>>, vector<1x16x32xbf16>
    %1 = vector.shape_cast %0 : vector<1x16x32xbf16> to vector<16x32xbf16>
    %c0_2 = arith.constant 0 : index
    %c0_3 = arith.constant 0 : index
    %2 = vector.load %arg6[%c0_2, %c0_3] : memref<32x32xbf16, #tpu.memory_space<vmem>>, vector<32x32xbf16>
    %cst = arith.constant dense<0.000000e+00> : vector<16x32xf32>
    %3 = tpu.matmul %1, %2, %cst {dimension_numbers = #tpu.dot_dimension_numbers<[1], [0], [0], [1], [0, 0, 1, 1], [], []>} : vector<16x32xbf16>, vector<32x32xbf16>, vector<16x32xf32> -> vector<16x32xf32>
    %c0_4 = arith.constant 0 : index
    %c0_5 = arith.constant 0 : index
    %4 = vector.load %arg7[%c0_4, %c0_5] : memref<1x32xf32, #tpu.memory_space<vmem>>, vector<1x32xf32>
    %5 = vector.broadcast %4 : vector<1x32xf32> to vector<16x32xf32>
    %6 = arith.addf %3, %5 : vector<16x32xf32>
    %c0_6 = arith.constant 0 : index
    %c0_7 = arith.constant 0 : index
    %c0_8 = arith.constant 0 : index
    %7 = vector.load %arg4[%c0_6, %c0_7, %c0_8] : memref<1x16x32xbf16, #tpu.memory_space<vmem>>, vector<1x16x32xbf16>
    %8 = vector.shape_cast %7 : vector<1x16x32xbf16> to vector<16x32xbf16>
    %9 = arith.extf %8 : vector<16x32xbf16> to vector<16x32xf32>
    %c0_9 = arith.constant 0 : index
    %c0_10 = arith.constant 0 : index
    %c0_11 = arith.constant 0 : index
    %10 = vector.load %arg5[%c0_9, %c0_10, %c0_11] : memref<1x1x32xf32, #tpu.memory_space<vmem>>, vector<1x1x32xf32>
    %11 = vector.shape_cast %10 : vector<1x1x32xf32> to vector<1x32xf32>
    %12 = vector.broadcast %11 : vector<1x32xf32> to vector<16x32xf32>
    %13 = arith.mulf %12, %6 : vector<16x32xf32>
    %14 = arith.addf %9, %13 : vector<16x32xf32>
    %15 = arith.truncf %14 : vector<16x32xf32> to vector<16x32xbf16>
    %c0_12 = arith.constant 0 : index
    %c0_13 = arith.constant 0 : index
    %c0_14 = arith.constant 0 : index
    %16 = vector.load %arg8[%c0_12, %c0_13, %c0_14] : memref<1x16x32xbf16, #tpu.memory_space<vmem>>, vector<1x16x32xbf16>
    %17 = vector.shape_cast %16 : vector<1x16x32xbf16> to vector<16x32xbf16>
    %18 = vector.shape_cast %15 : vector<16x32xbf16> to vector<1x16x32xbf16>
    tpu.vector_store %arg8[%c0_12, %c0_13, %c0_14], %18 {strides = array<i32>} : memref<1x16x32xbf16, #tpu.memory_space<vmem>>, vector<1x16x32xbf16>,
    return
  }
  func.func @transform_0(%arg0: i32, %arg1: i32, %arg2: i32) -> (i32, i32, i32) {
    %c0_i32 = arith.constant 0 : i32
    %c0_i32_0 = arith.constant 0 : i32
    return %arg1, %arg2, %c0_i32 : i32, i32, i32
  }
  func.func @transform_1(%arg0: i32, %arg1: i32, %arg2: i32) -> (i32, i32, i32) {
    %c0_i32 = arith.constant 0 : i32
    return %arg1, %arg2, %arg0 : i32, i32, i32
  }
  func.func @transform_2(%arg0: i32, %arg1: i32, %arg2: i32) -> (i32, i32, i32) {
    %c0_i32 = arith.constant 0 : i32
    %c0_i32_0 = arith.constant 0 : i32
    return %arg1, %c0_i32, %arg0 : i32, i32, i32
  }
  func.func @transform_3(%arg0: i32, %arg1: i32, %arg2: i32) -> (i32, i32) {
    %c0_i32 = arith.constant 0 : i32
    %c0_i32_0 = arith.constant 0 : i32
    return %c0_i32, %arg0 : i32, i32
  }
  func.func @transform_4(%arg0: i32, %arg1: i32, %arg2: i32) -> (i32, i32) {
    %c0_i32 = arith.constant 0 : i32
    %c0_i32_0 = arith.constant 0 : i32
    return %c0_i32, %arg0 : i32, i32
  }
  func.func @transform_5(%arg0: i32, %arg1: i32, %arg2: i32) -> (i32, i32, i32) {
    %c0_i32 = arith.constant 0 : i32
    return %arg1, %arg2, %arg0 : i32, i32, i32
  }
}

module attributes {stable_mosaic.version = 11 : i64} {
  func.func @_mha_kernel(%arg0: i32, %arg1: memref<1x16x32xbf16, #tpu.memory_space<vmem>>, %arg2: memref<1x16x32xbf16, #tpu.memory_space<vmem>>, %arg3: memref<1x16x32xbf16, #tpu.memory_space<vmem>>, %arg4: memref<1x16x32xbf16, #tpu.memory_space<vmem>>) attributes {dimension_semantics = [#tpu.dimension_semantics<parallel>], iteration_bounds = array<i64: 2>, scalar_prefetch = 0 : i64, scratch_operands = 0 : i64, tpu.core_type = #tpu.core_type<tc>, window_params = [{transform_indices = @transform_0, window_bounds = array<i64: 1, 16, 32>}, {transform_indices = @transform_1, window_bounds = array<i64: 1, 16, 32>}, {transform_indices = @transform_2, window_bounds = array<i64: 1, 16, 32>}, {transform_indices = @transform_3, window_bounds = array<i64: 1, 16, 32>}]} {
    %c0 = arith.constant 0 : index
    %c0_0 = arith.constant 0 : index
    %c0_1 = arith.constant 0 : index
    %0 = vector.load %arg1[%c0, %c0_0, %c0_1] : memref<1x16x32xbf16, #tpu.memory_space<vmem>>, vector<1x16x32xbf16>
    %1 = vector.shape_cast %0 : vector<1x16x32xbf16> to vector<16x32xbf16>
    %c0_2 = arith.constant 0 : index
    %c0_3 = arith.constant 0 : index
    %c0_4 = arith.constant 0 : index
    %2 = vector.load %arg2[%c0_2, %c0_3, %c0_4] : memref<1x16x32xbf16, #tpu.memory_space<vmem>>, vector<1x16x32xbf16>
    %3 = vector.shape_cast %2 : vector<1x16x32xbf16> to vector<16x32xbf16>
    %c0_5 = arith.constant 0 : index
    %c0_6 = arith.constant 0 : index
    %c0_7 = arith.constant 0 : index
    %4 = vector.load %arg3[%c0_5, %c0_6, %c0_7] : memref<1x16x32xbf16, #tpu.memory_space<vmem>>, vector<1x16x32xbf16>
    %5 = vector.shape_cast %4 : vector<1x16x32xbf16> to vector<16x32xbf16>
    %6 = vector.extract_strided_slice %1 {offsets = [0, 0], sizes = [16, 8], strides = [1, 1]} : vector<16x32xbf16> to vector<16x8xbf16>
    %7 = vector.extract_strided_slice %3 {offsets = [0, 0], sizes = [16, 8], strides = [1, 1]} : vector<16x32xbf16> to vector<16x8xbf16>
    %8 = vector.extract_strided_slice %5 {offsets = [0, 0], sizes = [16, 8], strides = [1, 1]} : vector<16x32xbf16> to vector<16x8xbf16>
    %cst = arith.constant dense<0.000000e+00> : vector<16x16xf32>
    %9 = tpu.matmul %6, %7, %cst {dimension_numbers = #tpu.dot_dimension_numbers<[1], [1], [0], [0], [0, 0, 1, 0], [], []>} : vector<16x8xbf16>, vector<16x8xbf16>, vector<16x16xf32> -> vector<16x16xf32>
    %cst_8 = arith.constant dense<0xFF800000> : vector<16xf32>
    %10 = vector.multi_reduction <maximumf>, %9, %cst_8 [1] : vector<16x16xf32> to vector<16xf32>
    %11 = vector.shape_cast %10 : vector<16xf32> to vector<16x1xf32>
    %12 = vector.broadcast %11 : vector<16x1xf32> to vector<16x16xf32>
    %13 = arith.subf %9, %12 : vector<16x16xf32>
    %14 = math.exp %13 : vector<16x16xf32>
    %cst_9 = arith.constant dense<0.000000e+00> : vector<16xf32>
    %15 = vector.multi_reduction <add>, %14, %cst_9 [1] : vector<16x16xf32> to vector<16xf32>
    %16 = vector.shape_cast %15 : vector<16xf32> to vector<16x1xf32>
    %17 = tpu.reciprocal %16 {approx = true} : vector<16x1xf32> -> vector<16x1xf32>
    %18 = vector.broadcast %17 : vector<16x1xf32> to vector<16x16xf32>
    %19 = arith.mulf %14, %18 : vector<16x16xf32>
    %20 = arith.truncf %19 : vector<16x16xf32> to vector<16x16xbf16>
    %cst_10 = arith.constant dense<0.000000e+00> : vector<16x8xf32>
    %21 = tpu.matmul %20, %8, %cst_10 {dimension_numbers = #tpu.dot_dimension_numbers<[1], [0], [0], [1], [0, 0, 1, 1], [], []>} : vector<16x16xbf16>, vector<16x8xbf16>, vector<16x8xf32> -> vector<16x8xf32>
    %22 = arith.truncf %21 : vector<16x8xf32> to vector<16x8xbf16>
    %23 = vector.extract_strided_slice %1 {offsets = [0, 8], sizes = [16, 8], strides = [1, 1]} : vector<16x32xbf16> to vector<16x8xbf16>
    %24 = vector.extract_strided_slice %3 {offsets = [0, 8], sizes = [16, 8], strides = [1, 1]} : vector<16x32xbf16> to vector<16x8xbf16>
    %25 = vector.extract_strided_slice %5 {offsets = [0, 8], sizes = [16, 8], strides = [1, 1]} : vector<16x32xbf16> to vector<16x8xbf16>
    %cst_11 = arith.constant dense<0.000000e+00> : vector<16x16xf32>
    %26 = tpu.matmul %23, %24, %cst_11 {dimension_numbers = #tpu.dot_dimension_numbers<[1], [1], [0], [0], [0, 0, 1, 0], [], []>} : vector<16x8xbf16>, vector<16x8xbf16>, vector<16x16xf32> -> vector<16x16xf32>
    %cst_12 = arith.constant dense<0xFF800000> : vector<16xf32>
    %27 = vector.multi_reduction <maximumf>, %26, %cst_12 [1] : vector<16x16xf32> to vector<16xf32>
    %28 = vector.shape_cast %27 : vector<16xf32> to vector<16x1xf32>
    %29 = vector.broadcast %28 : vector<16x1xf32> to vector<16x16xf32>
    %30 = arith.subf %26, %29 : vector<16x16xf32>
    %31 = math.exp %30 : vector<16x16xf32>
    %cst_13 = arith.constant dense<0.000000e+00> : vector<16xf32>
    %32 = vector.multi_reduction <add>, %31, %cst_13 [1] : vector<16x16xf32> to vector<16xf32>
    %33 = vector.shape_cast %32 : vector<16xf32> to vector<16x1xf32>
    %34 = tpu.reciprocal %33 {approx = true} : vector<16x1xf32> -> vector<16x1xf32>
    %35 = vector.broadcast %34 : vector<16x1xf32> to vector<16x16xf32>
    %36 = arith.mulf %31, %35 : vector<16x16xf32>
    %37 = arith.truncf %36 : vector<16x16xf32> to vector<16x16xbf16>
    %cst_14 = arith.constant dense<0.000000e+00> : vector<16x8xf32>
    %38 = tpu.matmul %37, %25, %cst_14 {dimension_numbers = #tpu.dot_dimension_numbers<[1], [0], [0], [1], [0, 0, 1, 1], [], []>} : vector<16x16xbf16>, vector<16x8xbf16>, vector<16x8xf32> -> vector<16x8xf32>
    %39 = arith.truncf %38 : vector<16x8xf32> to vector<16x8xbf16>
    %40 = vector.extract_strided_slice %1 {offsets = [0, 16], sizes = [16, 8], strides = [1, 1]} : vector<16x32xbf16> to vector<16x8xbf16>
    %41 = vector.extract_strided_slice %3 {offsets = [0, 16], sizes = [16, 8], strides = [1, 1]} : vector<16x32xbf16> to vector<16x8xbf16>
    %42 = vector.extract_strided_slice %5 {offsets = [0, 16], sizes = [16, 8], strides = [1, 1]} : vector<16x32xbf16> to vector<16x8xbf16>
    %cst_15 = arith.constant dense<0.000000e+00> : vector<16x16xf32>
    %43 = tpu.matmul %40, %41, %cst_15 {dimension_numbers = #tpu.dot_dimension_numbers<[1], [1], [0], [0], [0, 0, 1, 0], [], []>} : vector<16x8xbf16>, vector<16x8xbf16>, vector<16x16xf32> -> vector<16x16xf32>
    %cst_16 = arith.constant dense<0xFF800000> : vector<16xf32>
    %44 = vector.multi_reduction <maximumf>, %43, %cst_16 [1] : vector<16x16xf32> to vector<16xf32>
    %45 = vector.shape_cast %44 : vector<16xf32> to vector<16x1xf32>
    %46 = vector.broadcast %45 : vector<16x1xf32> to vector<16x16xf32>
    %47 = arith.subf %43, %46 : vector<16x16xf32>
    %48 = math.exp %47 : vector<16x16xf32>
    %cst_17 = arith.constant dense<0.000000e+00> : vector<16xf32>
    %49 = vector.multi_reduction <add>, %48, %cst_17 [1] : vector<16x16xf32> to vector<16xf32>
    %50 = vector.shape_cast %49 : vector<16xf32> to vector<16x1xf32>
    %51 = tpu.reciprocal %50 {approx = true} : vector<16x1xf32> -> vector<16x1xf32>
    %52 = vector.broadcast %51 : vector<16x1xf32> to vector<16x16xf32>
    %53 = arith.mulf %48, %52 : vector<16x16xf32>
    %54 = arith.truncf %53 : vector<16x16xf32> to vector<16x16xbf16>
    %cst_18 = arith.constant dense<0.000000e+00> : vector<16x8xf32>
    %55 = tpu.matmul %54, %42, %cst_18 {dimension_numbers = #tpu.dot_dimension_numbers<[1], [0], [0], [1], [0, 0, 1, 1], [], []>} : vector<16x16xbf16>, vector<16x8xbf16>, vector<16x8xf32> -> vector<16x8xf32>
    %56 = arith.truncf %55 : vector<16x8xf32> to vector<16x8xbf16>
    %57 = vector.extract_strided_slice %1 {offsets = [0, 24], sizes = [16, 8], strides = [1, 1]} : vector<16x32xbf16> to vector<16x8xbf16>
    %58 = vector.extract_strided_slice %3 {offsets = [0, 24], sizes = [16, 8], strides = [1, 1]} : vector<16x32xbf16> to vector<16x8xbf16>
    %59 = vector.extract_strided_slice %5 {offsets = [0, 24], sizes = [16, 8], strides = [1, 1]} : vector<16x32xbf16> to vector<16x8xbf16>
    %cst_19 = arith.constant dense<0.000000e+00> : vector<16x16xf32>
    %60 = tpu.matmul %57, %58, %cst_19 {dimension_numbers = #tpu.dot_dimension_numbers<[1], [1], [0], [0], [0, 0, 1, 0], [], []>} : vector<16x8xbf16>, vector<16x8xbf16>, vector<16x16xf32> -> vector<16x16xf32>
    %cst_20 = arith.constant dense<0xFF800000> : vector<16xf32>
    %61 = vector.multi_reduction <maximumf>, %60, %cst_20 [1] : vector<16x16xf32> to vector<16xf32>
    %62 = vector.shape_cast %61 : vector<16xf32> to vector<16x1xf32>
    %63 = vector.broadcast %62 : vector<16x1xf32> to vector<16x16xf32>
    %64 = arith.subf %60, %63 : vector<16x16xf32>
    %65 = math.exp %64 : vector<16x16xf32>
    %cst_21 = arith.constant dense<0.000000e+00> : vector<16xf32>
    %66 = vector.multi_reduction <add>, %65, %cst_21 [1] : vector<16x16xf32> to vector<16xf32>
    %67 = vector.shape_cast %66 : vector<16xf32> to vector<16x1xf32>
    %68 = tpu.reciprocal %67 {approx = true} : vector<16x1xf32> -> vector<16x1xf32>
    %69 = vector.broadcast %68 : vector<16x1xf32> to vector<16x16xf32>
    %70 = arith.mulf %65, %69 : vector<16x16xf32>
    %71 = arith.truncf %70 : vector<16x16xf32> to vector<16x16xbf16>
    %cst_22 = arith.constant dense<0.000000e+00> : vector<16x8xf32>
    %72 = tpu.matmul %71, %59, %cst_22 {dimension_numbers = #tpu.dot_dimension_numbers<[1], [0], [0], [1], [0, 0, 1, 1], [], []>} : vector<16x16xbf16>, vector<16x8xbf16>, vector<16x8xf32> -> vector<16x8xf32>
    %73 = arith.truncf %72 : vector<16x8xf32> to vector<16x8xbf16>
    %74 = tpu.concatenate %22, %39, %56, %73 in 1 : vector<16x8xbf16>, vector<16x8xbf16>, vector<16x8xbf16>, vector<16x8xbf16> -> vector<16x32xbf16>
    %c0_23 = arith.constant 0 : index
    %c0_24 = arith.constant 0 : index
    %c0_25 = arith.constant 0 : index
    %75 = vector.load %arg4[%c0_23, %c0_24, %c0_25] : memref<1x16x32xbf16, #tpu.memory_space<vmem>>, vector<1x16x32xbf16>
    %76 = vector.shape_cast %75 : vector<1x16x32xbf16> to vector<16x32xbf16>
    %77 = vector.shape_cast %74 : vector<16x32xbf16> to vector<1x16x32xbf16>
    tpu.vector_store %arg4[%c0_23, %c0_24, %c0_25], %77 {strides = array<i32>} : memref<1x16x32xbf16, #tpu.memory_space<vmem>>, vector<1x16x32xbf16>,
    return
  }
  func.func @transform_0(%arg0: i32) -> (i32, i32, i32) {
    %c0_i32 = arith.constant 0 : i32
    %c0_i32_0 = arith.constant 0 : i32
    %c0_i32_1 = arith.constant 0 : i32
    return %arg0, %c0_i32, %c0_i32_0 : i32, i32, i32
  }
  func.func @transform_1(%arg0: i32) -> (i32, i32, i32) {
    %c0_i32 = arith.constant 0 : i32
    %c0_i32_0 = arith.constant 0 : i32
    %c0_i32_1 = arith.constant 0 : i32
    return %arg0, %c0_i32, %c0_i32_0 : i32, i32, i32
  }
  func.func @transform_2(%arg0: i32) -> (i32, i32, i32) {
    %c0_i32 = arith.constant 0 : i32
    %c0_i32_0 = arith.constant 0 : i32
    %c0_i32_1 = arith.constant 0 : i32
    return %arg0, %c0_i32, %c0_i32_0 : i32, i32, i32
  }
  func.func @transform_3(%arg0: i32) -> (i32, i32, i32) {
    %c0_i32 = arith.constant 0 : i32
    %c0_i32_0 = arith.constant 0 : i32
    %c0_i32_1 = arith.constant 0 : i32
    return %arg0, %c0_i32, %c0_i32_0 : i32, i32, i32
  }
}

module attributes {stable_mosaic.version = 11 : i64} {
  func.func @_ada_linear_kernel(%arg0: i32, %arg1: i32, %arg2: i32, %arg3: memref<1x16x32xbf16, #tpu.memory_space<vmem>>, %arg4: memref<1x2x32xf32, #tpu.memory_space<vmem>>, %arg5: memref<32x128xbf16, #tpu.memory_space<vmem>>, %arg6: memref<1x128xf32, #tpu.memory_space<vmem>>, %arg7: memref<1x16x128xbf16, #tpu.memory_space<vmem>>) attributes {dimension_semantics = [#tpu.dimension_semantics<arbitrary>, #tpu.dimension_semantics<parallel>, #tpu.dimension_semantics<parallel>], iteration_bounds = array<i64: 1, 2, 1>, scalar_prefetch = 0 : i64, scratch_operands = 0 : i64, tpu.core_type = #tpu.core_type<tc>, window_params = [{transform_indices = @transform_0, window_bounds = array<i64: 1, 16, 32>}, {transform_indices = @transform_1, window_bounds = array<i64: 1, 2, 32>}, {transform_indices = @transform_2, window_bounds = array<i64: 32, 128>}, {transform_indices = @transform_3, window_bounds = array<i64: 1, 128>}, {transform_indices = @transform_4, window_bounds = array<i64: 1, 16, 128>}]} {
    %c0 = arith.constant 0 : index
    %c0_0 = arith.constant 0 : index
    %c0_1 = arith.constant 0 : index
    %0 = vector.load %arg3[%c0, %c0_0, %c0_1] : memref<1x16x32xbf16, #tpu.memory_space<vmem>>, vector<1x16x32xbf16>
    %1 = vector.shape_cast %0 : vector<1x16x32xbf16> to vector<16x32xbf16>
    %2 = arith.extf %1 : vector<16x32xbf16> to vector<16x32xf32>
    %c0_2 = arith.constant 0 : index
    %c0_3 = arith.constant 0 : index
    %c0_4 = arith.constant 0 : index
    %3 = vector.load %arg4[%c0_2, %c0_3, %c0_4] : memref<1x2x32xf32, #tpu.memory_space<vmem>>, vector<1x2x32xf32>
    %4 = vector.shape_cast %3 : vector<1x2x32xf32> to vector<2x32xf32>
    %5 = vector.extract_strided_slice %4 {offsets = [0, 0], sizes = [1, 32], strides = [1, 1]} : vector<2x32xf32> to vector<1x32xf32>
    %6 = vector.extract_strided_slice %4 {offsets = [1, 0], sizes = [1, 32], strides = [1, 1]} : vector<2x32xf32> to vector<1x32xf32>
    %cst = arith.constant dense<0.000000e+00> : vector<16xf32>
    %7 = vector.multi_reduction <add>, %2, %cst [1] : vector<16x32xf32> to vector<16xf32>
    %8 = vector.shape_cast %7 : vector<16xf32> to vector<16x1xf32>
    %cst_5 = arith.constant 3.200000e+01 : f32
    %9 = vector.broadcast %cst_5 : f32 to vector<16x1xf32>
    %10 = arith.divf %8, %9 : vector<16x1xf32>
    %11 = vector.broadcast %10 : vector<16x1xf32> to vector<16x32xf32>
    %12 = arith.subf %2, %11 : vector<16x32xf32>
    %13 = arith.mulf %12, %12 : vector<16x32xf32>
    %cst_6 = arith.constant dense<0.000000e+00> : vector<16xf32>
    %14 = vector.multi_reduction <add>, %13, %cst_6 [1] : vector<16x32xf32> to vector<16xf32>
    %15 = vector.shape_cast %14 : vector<16xf32> to vector<16x1xf32>
    %cst_7 = arith.constant 3.200000e+01 : f32
    %16 = vector.broadcast %cst_7 : f32 to vector<16x1xf32>
    %17 = arith.divf %15, %16 : vector<16x1xf32>
    %18 = vector.broadcast %10 : vector<16x1xf32> to vector<16x32xf32>
    %19 = arith.subf %2, %18 : vector<16x32xf32>
    %cst_8 = arith.constant 9.99999997E-7 : f32
    %20 = vector.broadcast %cst_8 : f32 to vector<16x1xf32>
    %21 = arith.addf %17, %20 : vector<16x1xf32>
    %22 = math.rsqrt %21 : vector<16x1xf32>
    %23 = vector.broadcast %22 : vector<16x1xf32> to vector<16x32xf32>
    %24 = arith.mulf %19, %23 : vector<16x32xf32>
    %cst_9 = arith.constant 1.000000e+00 : f32
    %25 = vector.broadcast %cst_9 : f32 to vector<1x32xf32>
    %26 = arith.addf %25, %6 : vector<1x32xf32>
    %27 = vector.broadcast %26 : vector<1x32xf32> to vector<16x32xf32>
    %28 = arith.mulf %24, %27 : vector<16x32xf32>
    %29 = vector.broadcast %5 : vector<1x32xf32> to vector<16x32xf32>
    %30 = arith.addf %28, %29 : vector<16x32xf32>
    %31 = arith.truncf %30 : vector<16x32xf32> to vector<16x32xbf16>
    %c0_10 = arith.constant 0 : index
    %c0_11 = arith.constant 0 : index
    %32 = vector.load %arg5[%c0_10, %c0_11] : memref<32x128xbf16, #tpu.memory_space<vmem>>, vector<32x128xbf16>
    %cst_12 = arith.constant dense<0.000000e+00> : vector<16x128xf32>
    %33 = tpu.matmul %31, %32, %cst_12 {dimension_numbers = #tpu.dot_dimension_numbers<[1], [0], [0], [1], [0, 0, 1, 1], [], []>} : vector<16x32xbf16>, vector<32x128xbf16>, vector<16x128xf32> -> vector<16x128xf32>
    %c0_13 = arith.constant 0 : index
    %c0_14 = arith.constant 0 : index
    %34 = vector.load %arg6[%c0_13, %c0_14] : memref<1x128xf32, #tpu.memory_space<vmem>>, vector<1x128xf32>
    %35 = vector.broadcast %34 : vector<1x128xf32> to vector<16x128xf32>
    %36 = arith.addf %33, %35 : vector<16x128xf32>
    %37 = arith.mulf %36, %36 : vector<16x128xf32>
    %38 = arith.mulf %36, %37 : vector<16x128xf32>
    %cst_15 = arith.constant 4.471500e-02 : f32
    %39 = vector.broadcast %cst_15 : f32 to vector<16x128xf32>
    %40 = arith.mulf %39, %38 : vector<16x128xf32>
    %41 = arith.addf %36, %40 : vector<16x128xf32>
    %cst_16 = arith.constant 0.797884583 : f32
    %42 = vector.broadcast %cst_16 : f32 to vector<16x128xf32>
    %43 = arith.mulf %42, %41 : vector<16x128xf32>
    %44 = math.tanh %43 : vector<16x128xf32>
    %cst_17 = arith.constant 1.000000e+00 : f32
    %45 = vector.broadcast %cst_17 : f32 to vector<16x128xf32>
    %46 = arith.addf %45, %44 : vector<16x128xf32>
    %cst_18 = arith.constant 5.000000e-01 : f32
    %47 = vector.broadcast %cst_18 : f32 to vector<16x128xf32>
    %48 = arith.mulf %47, %46 : vector<16x128xf32>
    %49 = arith.mulf %36, %48 : vector<16x128xf32>
    %50 = arith.truncf %49 : vector<16x128xf32> to vector<16x128xbf16>
    %c0_19 = arith.constant 0 : index
    %c0_20 = arith.constant 0 : index
    %c0_21 = arith.constant 0 : index
    %51 = vector.load %arg7[%c0_19, %c0_20, %c0_21] : memref<1x16x128xbf16, #tpu.memory_space<vmem>>, vector<1x16x128xbf16>
    %52 = vector.shape_cast %51 : vector<1x16x128xbf16> to vector<16x128xbf16>
    %53 = vector.shape_cast %50 : vector<16x128xbf16> to vector<1x16x128xbf16>
    tpu.vector_store %arg7[%c0_19, %c0_20, %c0_21], %53 {strides = array<i32>} : memref<1x16x128xbf16, #tpu.memory_space<vmem>>, vector<1x16x128xbf16>,
    return
  }
  func.func @transform_0(%arg0: i32, %arg1: i32, %arg2: i32) -> (i32, i32, i32) {
    %c0_i32 = arith.constant 0 : i32
    %c0_i32_0 = arith.constant 0 : i32
    return %arg1, %arg2, %c0_i32 : i32, i32, i32
  }
  func.func @transform_1(%arg0: i32, %arg1: i32, %arg2: i32) -> (i32, i32, i32) {
    %c0_i32 = arith.constant 0 : i32
    %c0_i32_0 = arith.constant 0 : i32
    %c0_i32_1 = arith.constant 0 : i32
    return %arg1, %c0_i32, %c0_i32_0 : i32, i32, i32
  }
  func.func @transform_2(%arg0: i32, %arg1: i32, %arg2: i32) -> (i32, i32) {
    %c0_i32 = arith.constant 0 : i32
    %c0_i32_0 = arith.constant 0 : i32
    return %c0_i32, %arg0 : i32, i32
  }
  func.func @transform_3(%arg0: i32, %arg1: i32, %arg2: i32) -> (i32, i32) {
    %c0_i32 = arith.constant 0 : i32
    %c0_i32_0 = arith.constant 0 : i32
    return %c0_i32, %arg0 : i32, i32
  }
  func.func @transform_4(%arg0: i32, %arg1: i32, %arg2: i32) -> (i32, i32, i32) {
    %c0_i32 = arith.constant 0 : i32
    return %arg1, %arg2, %arg0 : i32, i32, i32
  }
}

module attributes {stable_mosaic.version = 11 : i64} {
  func.func @_gated_linear_kernel(%arg0: i32, %arg1: i32, %arg2: i32, %arg3: memref<1x16x128xbf16, #tpu.memory_space<vmem>>, %arg4: memref<1x16x32xbf16, #tpu.memory_space<vmem>>, %arg5: memref<1x1x32xf32, #tpu.memory_space<vmem>>, %arg6: memref<128x32xbf16, #tpu.memory_space<vmem>>, %arg7: memref<1x32xf32, #tpu.memory_space<vmem>>, %arg8: memref<1x16x32xbf16, #tpu.memory_space<vmem>>) attributes {dimension_semantics = [#tpu.dimension_semantics<arbitrary>, #tpu.dimension_semantics<parallel>, #tpu.dimension_semantics<parallel>], iteration_bounds = array<i64: 1, 2, 1>, scalar_prefetch = 0 : i64, scratch_operands = 0 : i64, tpu.core_type = #tpu.core_type<tc>, window_params = [{transform_indices = @transform_0, window_bounds = array<i64: 1, 16, 128>}, {transform_indices = @transform_1, window_bounds = array<i64: 1, 16, 32>}, {transform_indices = @transform_2, window_bounds = array<i64: 1, 1, 32>}, {transform_indices = @transform_3, window_bounds = array<i64: 128, 32>}, {transform_indices = @transform_4, window_bounds = array<i64: 1, 32>}, {transform_indices = @transform_5, window_bounds = array<i64: 1, 16, 32>}]} {
    %c0 = arith.constant 0 : index
    %c0_0 = arith.constant 0 : index
    %c0_1 = arith.constant 0 : index
    %0 = vector.load %arg3[%c0, %c0_0, %c0_1] : memref<1x16x128xbf16, #tpu.memory_space<vmem>>, vector<1x16x128xbf16>
    %1 = vector.shape_cast %0 : vector<1x16x128xbf16> to vector<16x128xbf16>
    %c0_2 = arith.constant 0 : index
    %c0_3 = arith.constant 0 : index
    %2 = vector.load %arg6[%c0_2, %c0_3] : memref<128x32xbf16, #tpu.memory_space<vmem>>, vector<128x32xbf16>
    %cst = arith.constant dense<0.000000e+00> : vector<16x32xf32>
    %3 = tpu.matmul %1, %2, %cst {dimension_numbers = #tpu.dot_dimension_numbers<[1], [0], [0], [1], [0, 0, 1, 1], [], []>} : vector<16x128xbf16>, vector<128x32xbf16>, vector<16x32xf32> -> vector<16x32xf32>
    %c0_4 = arith.constant 0 : index
    %c0_5 = arith.constant 0 : index
    %4 = vector.load %arg7[%c0_4, %c0_5] : memref<1x32xf32, #tpu.memory_space<vmem>>, vector<1x32xf32>
    %5 = vector.broadcast %4 : vector<1x32xf32> to vector<16x32xf32>
    %6 = arith.addf %3, %5 : vector<16x32xf32>
    %c0_6 = arith.constant 0 : index
    %c0_7 = arith.constant 0 : index
    %c0_8 = arith.constant 0 : index
    %7 = vector.load %arg4[%c0_6, %c0_7, %c0_8] : memref<1x16x32xbf16, #tpu.memory_space<vmem>>, vector<1x16x32xbf16>
    %8 = vector.shape_cast %7 : vector<1x16x32xbf16> to vector<16x32xbf16>
    %9 = arith.extf %8 : vector<16x32xbf16> to vector<16x32xf32>
    %c0_9 = arith.constant 0 : index
    %c0_10 = arith.constant 0 : index
    %c0_11 = arith.constant 0 : index
    %10 = vector.load %arg5[%c0_9, %c0_10, %c0_11] : memref<1x1x32xf32, #tpu.memory_space<vmem>>, vector<1x1x32xf32>
    %11 = vector.shape_cast %10 : vector<1x1x32xf32> to vector<1x32xf32>
    %12 = vector.broadcast %11 : vector<1x32xf32> to vector<16x32xf32>
    %13 = arith.mulf %12, %6 : vector<16x32xf32>
    %14 = arith.addf %9, %13 : vector<16x32xf32>
    %15 = arith.truncf %14 : vector<16x32xf32> to vector<16x32xbf16>
    %c0_12 = arith.constant 0 : index
    %c0_13 = arith.constant 0 : index
    %c0_14 = arith.constant 0 : index
    %16 = vector.load %arg8[%c0_12, %c0_13, %c0_14] : memref<1x16x32xbf16, #tpu.memory_space<vmem>>, vector<1x16x32xbf16>
    %17 = vector.shape_cast %16 : vector<1x16x32xbf16> to vector<16x32xbf16>
    %18 = vector.shape_cast %15 : vector<16x32xbf16> to vector<1x16x32xbf16>
    tpu.vector_store %arg8[%c0_12, %c0_13, %c0_14], %18 {strides = array<i32>} : memref<1x16x32xbf16, #tpu.memory_space<vmem>>, vector<1x16x32xbf16>,
    return
  }
  func.func @transform_0(%arg0: i32, %arg1: i32, %arg2: i32) -> (i32, i32, i32) {
    %c0_i32 = arith.constant 0 : i32
    %c0_i32_0 = arith.constant 0 : i32
    return %arg1, %arg2, %c0_i32 : i32, i32, i32
  }
  func.func @transform_1(%arg0: i32, %arg1: i32, %arg2: i32) -> (i32, i32, i32) {
    %c0_i32 = arith.constant 0 : i32
    return %arg1, %arg2, %arg0 : i32, i32, i32
  }
  func.func @transform_2(%arg0: i32, %arg1: i32, %arg2: i32) -> (i32, i32, i32) {
    %c0_i32 = arith.constant 0 : i32
    %c0_i32_0 = arith.constant 0 : i32
    return %arg1, %c0_i32, %arg0 : i32, i32, i32
  }
  func.func @transform_3(%arg0: i32, %arg1: i32, %arg2: i32) -> (i32, i32) {
    %c0_i32 = arith.constant 0 : i32
    %c0_i32_0 = arith.constant 0 : i32
    return %c0_i32, %arg0 : i32, i32
  }
  func.func @transform_4(%arg0: i32, %arg1: i32, %arg2: i32) -> (i32, i32) {
    %c0_i32 = arith.constant 0 : i32
    %c0_i32_0 = arith.constant 0 : i32
    return %c0_i32, %arg0 : i32, i32
  }
  func.func @transform_5(%arg0: i32, %arg1: i32, %arg2: i32) -> (i32, i32, i32) {
    %c0_i32 = arith.constant 0 : i32
    return %arg1, %arg2, %arg0 : i32, i32, i32
  }
}

module attributes {stable_mosaic.version = 11 : i64} {
  func.func @_ada_linear_kernel(%arg0: i32, %arg1: i32, %arg2: i32, %arg3: memref<1x16x32xbf16, #tpu.memory_space<vmem>>, %arg4: memref<1x2x32xf32, #tpu.memory_space<vmem>>, %arg5: memref<32x128xbf16, #tpu.memory_space<vmem>>, %arg6: memref<1x128xf32, #tpu.memory_space<vmem>>, %arg7: memref<1x16x128xf32, #tpu.memory_space<vmem>>) attributes {dimension_semantics = [#tpu.dimension_semantics<arbitrary>, #tpu.dimension_semantics<parallel>, #tpu.dimension_semantics<parallel>], iteration_bounds = array<i64: 1, 2, 1>, scalar_prefetch = 0 : i64, scratch_operands = 0 : i64, tpu.core_type = #tpu.core_type<tc>, window_params = [{transform_indices = @transform_0, window_bounds = array<i64: 1, 16, 32>}, {transform_indices = @transform_1, window_bounds = array<i64: 1, 2, 32>}, {transform_indices = @transform_2, window_bounds = array<i64: 32, 128>}, {transform_indices = @transform_3, window_bounds = array<i64: 1, 128>}, {transform_indices = @transform_4, window_bounds = array<i64: 1, 16, 128>}]} {
    %c0 = arith.constant 0 : index
    %c0_0 = arith.constant 0 : index
    %c0_1 = arith.constant 0 : index
    %0 = vector.load %arg3[%c0, %c0_0, %c0_1] : memref<1x16x32xbf16, #tpu.memory_space<vmem>>, vector<1x16x32xbf16>
    %1 = vector.shape_cast %0 : vector<1x16x32xbf16> to vector<16x32xbf16>
    %2 = arith.extf %1 : vector<16x32xbf16> to vector<16x32xf32>
    %c0_2 = arith.constant 0 : index
    %c0_3 = arith.constant 0 : index
    %c0_4 = arith.constant 0 : index
    %3 = vector.load %arg4[%c0_2, %c0_3, %c0_4] : memref<1x2x32xf32, #tpu.memory_space<vmem>>, vector<1x2x32xf32>
    %4 = vector.shape_cast %3 : vector<1x2x32xf32> to vector<2x32xf32>
    %5 = vector.extract_strided_slice %4 {offsets = [0, 0], sizes = [1, 32], strides = [1, 1]} : vector<2x32xf32> to vector<1x32xf32>
    %6 = vector.extract_strided_slice %4 {offsets = [1, 0], sizes = [1, 32], strides = [1, 1]} : vector<2x32xf32> to vector<1x32xf32>
    %cst = arith.constant dense<0.000000e+00> : vector<16xf32>
    %7 = vector.multi_reduction <add>, %2, %cst [1] : vector<16x32xf32> to vector<16xf32>
    %8 = vector.shape_cast %7 : vector<16xf32> to vector<16x1xf32>
    %cst_5 = arith.constant 3.200000e+01 : f32
    %9 = vector.broadcast %cst_5 : f32 to vector<16x1xf32>
    %10 = arith.divf %8, %9 : vector<16x1xf32>
    %11 = vector.broadcast %10 : vector<16x1xf32> to vector<16x32xf32>
    %12 = arith.subf %2, %11 : vector<16x32xf32>
    %13 = arith.mulf %12, %12 : vector<16x32xf32>
    %cst_6 = arith.constant dense<0.000000e+00> : vector<16xf32>
    %14 = vector.multi_reduction <add>, %13, %cst_6 [1] : vector<16x32xf32> to vector<16xf32>
    %15 = vector.shape_cast %14 : vector<16xf32> to vector<16x1xf32>
    %cst_7 = arith.constant 3.200000e+01 : f32
    %16 = vector.broadcast %cst_7 : f32 to vector<16x1xf32>
    %17 = arith.divf %15, %16 : vector<16x1xf32>
    %18 = vector.broadcast %10 : vector<16x1xf32> to vector<16x32xf32>
    %19 = arith.subf %2, %18 : vector<16x32xf32>
    %cst_8 = arith.constant 9.99999997E-7 : f32
    %20 = vector.broadcast %cst_8 : f32 to vector<16x1xf32>
    %21 = arith.addf %17, %20 : vector<16x1xf32>
    %22 = math.rsqrt %21 : vector<16x1xf32>
    %23 = vector.broadcast %22 : vector<16x1xf32> to vector<16x32xf32>
    %24 = arith.mulf %19, %23 : vector<16x32xf32>
    %cst_9 = arith.constant 1.000000e+00 : f32
    %25 = vector.broadcast %cst_9 : f32 to vector<1x32xf32>
    %26 = arith.addf %25, %6 : vector<1x32xf32>
    %27 = vector.broadcast %26 : vector<1x32xf32> to vector<16x32xf32>
    %28 = arith.mulf %24, %27 : vector<16x32xf32>
    %29 = vector.broadcast %5 : vector<1x32xf32> to vector<16x32xf32>
    %30 = arith.addf %28, %29 : vector<16x32xf32>
    %31 = arith.truncf %30 : vector<16x32xf32> to vector<16x32xbf16>
    %c0_10 = arith.constant 0 : index
    %c0_11 = arith.constant 0 : index
    %32 = vector.load %arg5[%c0_10, %c0_11] : memref<32x128xbf16, #tpu.memory_space<vmem>>, vector<32x128xbf16>
    %cst_12 = arith.constant dense<0.000000e+00> : vector<16x128xf32>
    %33 = tpu.matmul %31, %32, %cst_12 {dimension_numbers = #tpu.dot_dimension_numbers<[1], [0], [0], [1], [0, 0, 1, 1], [], []>} : vector<16x32xbf16>, vector<32x128xbf16>, vector<16x128xf32> -> vector<16x128xf32>
    %c0_13 = arith.constant 0 : index
    %c0_14 = arith.constant 0 : index
    %34 = vector.load %arg6[%c0_13, %c0_14] : memref<1x128xf32, #tpu.memory_space<vmem>>, vector<1x128xf32>
    %35 = vector.broadcast %34 : vector<1x128xf32> to vector<16x128xf32>
    %36 = arith.addf %33, %35 : vector<16x128xf32>
    %c0_15 = arith.constant 0 : index
    %c0_16 = arith.constant 0 : index
    %c0_17 = arith.constant 0 : index
    %37 = vector.load %arg7[%c0_15, %c0_16, %c0_17] : memref<1x16x128xf32, #tpu.memory_space<vmem>>, vector<1x16x128xf32>
    %38 = vector.shape_cast %37 : vector<1x16x128xf32> to vector<16x128xf32>
    %39 = vector.shape_cast %36 : vector<16x128xf32> to vector<1x16x128xf32>
    tpu.vector_store %arg7[%c0_15, %c0_16, %c0_17], %39 {strides = array<i32>} : memref<1x16x128xf32, #tpu.memory_space<vmem>>, vector<1x16x128xf32>,
    return
  }
  func.func @transform_0(%arg0: i32, %arg1: i32, %arg2: i32) -> (i32, i32, i32) {
    %c0_i32 = arith.constant 0 : i32
    %c0_i32_0 = arith.constant 0 : i32
    return %arg1, %arg2, %c0_i32 : i32, i32, i32
  }
  func.func @transform_1(%arg0: i32, %arg1: i32, %arg2: i32) -> (i32, i32, i32) {
    %c0_i32 = arith.constant 0 : i32
    %c0_i32_0 = arith.constant 0 : i32
    %c0_i32_1 = arith.constant 0 : i32
    return %arg1, %c0_i32, %c0_i32_0 : i32, i32, i32
  }
  func.func @transform_2(%arg0: i32, %arg1: i32, %arg2: i32) -> (i32, i32) {
    %c0_i32 = arith.constant 0 : i32
    %c0_i32_0 = arith.constant 0 : i32
    return %c0_i32, %arg0 : i32, i32
  }
  func.func @transform_3(%arg0: i32, %arg1: i32, %arg2: i32) -> (i32, i32) {
    %c0_i32 = arith.constant 0 : i32
    %c0_i32_0 = arith.constant 0 : i32
    return %c0_i32, %arg0 : i32, i32
  }
  func.func @transform_4(%arg0: i32, %arg1: i32, %arg2: i32) -> (i32, i32, i32) {
    %c0_i32 = arith.constant 0 : i32
    return %arg1, %arg2, %arg0 : i32, i32, i32
  }
}

</mosaic_0001>

<bundles_post_ra>
// kernel: dit_forward.19
= control target key start
LH: loop header
LB: loop body
LE: loop exit
PB: predicated region body
PF: predicated region fallthrough
CT: control target
= control target key end

     0   :  { %vm37_vm0 = vcmask 261120   ;;  %vm55_vm1 = vcmask 253952   ;;  %s108_s1 = inlined_call_operand.vmem [shape: bf16[32,32], index: 1, kind: input, shape index: {}]   ;;  %s109_s0 = inlined_call_operand.vmem [shape: f32[2,32], index: 0, kind: input, shape index: {}]   ;;  %s110_s2 = inlined_call_operand.vmem [shape: f32[1,32], index: 2, kind: input, shape index: {}]   ;;  %s111_s3 = inlined_call_operand.vmem [shape: bf16[2,32], index: 3, kind: output, shape index: {}]  }
   0x1   :  { %v71_v0 = vld [vmem:[%s108_s1 + $0x8] sm:$0xff]  ;;  %v70_v1 = vld [vmem:[%s108_s1] sm:$0xff] }
   0x2   :  { %47 = vmatpush.bf16.msra.mxu0 %v71_v0  ;;  %v15_v2 = vld [vmem:[%s109_s0] sm:$0x3] }
   0x3   :  { %v16_v3 = vpack.c.bf16 %v15_v2, %v15_v2  ;;  %v72_v4 = vld [vmem:[%s110_s2] ss:$0 sm:$0xff] }
   0x6   :  { %48 = vmatpush.bf16.msra.mxu0 %v70_v1 }
   0x9   :  { %69 = vmatmul.msk.bf16.vlgmr.msra.gmra.mxu0 %vm37_vm0, %v16_v3 }
  0x86   :  { %v50_v5 = vpop.f32.mrf.mxu0 }
  0x87   :  { %v51_v6 = vadd.f32 %v72_v4, %v50_v5 }
  0x89   :  { %v54_v7 = vpack.c.bf16 %v51_v6, %v51_v6 }
  0x8b   :  { %56 = vst.msk [vmem:[%s111_s3] sm:$0x1] %vm55_vm1, %v54_v7 }
  0x8e   :  { %v52_v8 = vpop.f32.mrf.mxu0 }

// kernel: dit_forward.16
= control target key start
LH: loop header
LB: loop body
LE: loop exit
PB: predicated region body
PF: predicated region fallthrough
CT: control target
= control target key end

     0   :  { %vm57_vm0 = vcmask 523264   ;;  %vm87_vm1 = vcmask 257024   ;;  %s182_s1 = inlined_call_operand.vmem [shape: bf16[64,32], index: 1, kind: input, shape index: {}]   ;;  %s183_s2 = inlined_call_operand.vmem [shape: f32[1,32], index: 2, kind: input, shape index: {}]   ;;  %s184_s0 = inlined_call_operand.vmem [shape: f32[32,64], index: 0, kind: input, shape index: {}]   ;;  %s185_s3 = inlined_call_operand.vmem [shape: bf16[32,32], index: 3, kind: output, shape index: {}]  }
   0x1   :  { %v117_v0 = vld [vmem:[%s182_s1 + $0x18] sm:$0xff]  ;;  %v116_v1 = vld [vmem:[%s182_s1 + $0x10] sm:$0xff]  ;;  %v115_v2 = vld [vmem:[%s182_s1 + $0x8] sm:$0xff] }
   0x2   :  { %68 = vmatpush.bf16.msra.mxu0 %v117_v0  ;;  %118 = vmatpush.bf16.msra.mxu1 %v117_v0  ;;  %v114_v3 = vld [vmem:[%s182_s1] sm:$0xff]  ;;  %v16_v5 = vld [vmem:[%s184_s0 + $0x8] sm:$0xff]  ;;  %v17_v6 = vld [vmem:[%s184_s0 + $0x10] sm:$0xff] }
   0x3   :  { %v15_v4 = vld [vmem:[%s184_s0] sm:$0xff]  ;;  %v18_v7 = vld [vmem:[%s184_s0 + $0x18] sm:$0xff] }
   0x4   :  { %v19_v8 = vpack.c.bf16 %v16_v5, %v15_v4  ;;  %v20_v9 = vpack.c.bf16 %v18_v7, %v17_v6  ;;  %v122_v10 = vld [vmem:[%s183_s2] ss:$0 sm:$0xff] }
   0x6   :  { %69 = vmatpush.bf16.msra.mxu0 %v116_v1  ;;  %119 = vmatpush.bf16.msra.mxu1 %v116_v1 }
   0xa   :  { %70 = vmatpush.bf16.msra.mxu0 %v115_v2  ;;  %120 = vmatpush.bf16.msra.mxu1 %v115_v2 }
   0xe   :  { %71 = vmatpush.bf16.msra.mxu0 %v114_v3  ;;  %121 = vmatpush.bf16.msra.mxu1 %v114_v3 }
  0x11   :  { %112 = vmatmul.msk.bf16.vlgmr.msra.gmra.mxu0 %vm57_vm0, %v19_v8  ;;  %113 = vmatmul.msk.bf16.vlgmr.msra.gmra.mxu1 %vm57_vm0, %v20_v9 }
  0x8e   :  { %v73_v11 = vpop.f32.mrf.mxu0  ;;  %v78_v12 = vpop.f32.mrf.mxu1 }
  0x8f   :  { %v74_v13 = vadd.f32 %v122_v10, %v73_v11  ;;  %v79_v14 = vadd.f32 %v122_v10, %v78_v12 }
  0x91   :  { %v83_v15 = vpack.c.bf16 %v74_v13, %v74_v13  ;;  %v85_v16 = vpack.c.bf16 %v79_v14, %v79_v14 }
  0x93   :  { %88 = vst.msk [vmem:[%s185_s3] sm:$0xf] %vm87_vm1, %v83_v15 }
  0x94   :  { %90 = vst.msk [vmem:[%s185_s3 + $0x8] sm:$0xf] %vm87_vm1, %v85_v16 }
  0x96   :  { %v75_v17 = vpop.f32.mrf.mxu0  ;;  %v80_v18 = vpop.f32.mrf.mxu1 }
  0x97   :  { %v76_v19 = vadd.f32 %v122_v10, %v75_v17  ;;  %v81_v20 = vadd.f32 %v122_v10, %v80_v18 }
  0x99   :  { %v84_v21 = vpack.c.bf16 %v76_v19, %v76_v19  ;;  %v86_v22 = vpack.c.bf16 %v81_v20, %v81_v20 }
  0x9b   :  { %89 = vst.msk [vmem:[%s185_s3 + $0x4] sm:$0xf] %vm87_vm1, %v84_v21 }
  0x9c   :  { %91 = vst.msk [vmem:[%s185_s3 + $0xc] sm:$0xf] %vm87_vm1, %v86_v22 }

// kernel: dit_forward.18
= control target key start
LH: loop header
LB: loop body
LE: loop exit
PB: predicated region body
PF: predicated region fallthrough
CT: control target
= control target key end

     0   :  { %vm36_vm0 = vcmask 261120   ;;  %vm54_vm1 = vcmask 253952   ;;  %s107_s1 = inlined_call_operand.vmem [shape: bf16[32,32], index: 1, kind: input, shape index: {}]   ;;  %s108_s2 = inlined_call_operand.vmem [shape: f32[1,32], index: 2, kind: input, shape index: {}]   ;;  %s109_s0 = inlined_call_operand.vmem [shape: bf16[2,32], index: 0, kind: input, shape index: {}]   ;;  %s110_s3 = inlined_call_operand.vmem [shape: bf16[2,32], index: 3, kind: output, shape index: {}]  }
   0x1   :  { %v70_v0 = vld [vmem:[%s107_s1 + $0x8] sm:$0xff]  ;;  %v69_v1 = vld [vmem:[%s107_s1] sm:$0xff] }
   0x2   :  { %46 = vmatpush.bf16.msra.mxu0 %v70_v0  ;;  %v15_v2 = vld [vmem:[%s109_s0] sm:$0x1] }
   0x3   :  { %v71_v3 = vld [vmem:[%s108_s2] ss:$0 sm:$0xff] }
   0x6   :  { %47 = vmatpush.bf16.msra.mxu0 %v69_v1 }
   0x9   :  { %68 = vmatmul.msk.bf16.vlgmr.msra.gmra.mxu0 %vm36_vm0, %v15_v2 }
  0x86   :  { %v49_v4 = vpop.f32.mrf.mxu0 }
  0x87   :  { %v50_v5 = vadd.f32 %v71_v3, %v49_v4 }
  0x89   :  { %v53_v6 = vpack.c.bf16 %v50_v5, %v50_v5 }
  0x8b   :  { %55 = vst.msk [vmem:[%s110_s3] sm:$0x1] %vm54_vm1, %v53_v6 }
  0x8e   :  { %v51_v7 = vpop.f32.mrf.mxu0 }

// kernel: dit_forward.17
= control target key start
LH: loop header
LB: loop body
LE: loop exit
PB: predicated region body
PF: predicated region fallthrough
CT: control target
= control target key end

     0   :  { %vm202_vm4 = vcmask 253952   ;;  %s371_s1 = inlined_call_operand.vmem [shape: bf16[256,32], index: 1, kind: input, shape index: {}]   ;;  %s372_s0 = inlined_call_operand.vmem [shape: f32[2,256], index: 0, kind: input, shape index: {}]   ;;  %s373_s2 = inlined_call_operand.vmem [shape: f32[1,32], index: 2, kind: input, shape index: {}]   ;;  %s374_s3 = inlined_call_operand.vmem [shape: bf16[2,32], index: 3, kind: output, shape index: {}]  }
   0x1   :  { %v280_v0 = vld [vmem:[%s371_s1 + $0x38] sm:$0xff]  ;;  %v279_v2 = vld [vmem:[%s371_s1 + $0x30] sm:$0xff]  ;;  %v14_v4 = vld [vmem:[%s372_s0] sm:$0xf] }
   0x2   :  { %v288_v1 = vld [vmem:[%s371_s1 + $0x78] sm:$0xff]  ;;  %155 = vmatpush.bf16.msra.mxu0 %v280_v0  ;;  %v287_v3 = vld [vmem:[%s371_s1 + $0x70] sm:$0xff]  ;;  %v278_v5 = vld [vmem:[%s371_s1 + $0x28] sm:$0xff]  ;;  %16 = vst [vmem:[#allocation1] ss:$4 sm:$0xff] %v14_v4 }
   0x3   :  { %168 = vmatpush.bf16.msra.mxu1 %v288_v1  ;;  %v286_v6 = vld [vmem:[%s371_s1 + $0x68] sm:$0xff]  ;;  %v277_v7 = vld [vmem:[%s371_s1 + $0x20] sm:$0xff]  ;;  %v276_v9 = vld [vmem:[%s371_s1 + $0x18] sm:$0xff] }
   0x4   :  { %v285_v8 = vld [vmem:[%s371_s1 + $0x60] sm:$0xff]  ;;  %v284_v10 = vld [vmem:[%s371_s1 + $0x58] sm:$0xff]  ;;  %v275_v11 = vld [vmem:[%s371_s1 + $0x10] sm:$0xff] }
   0x5   :  { %v283_v12 = vld [vmem:[%s371_s1 + $0x50] sm:$0xff]  ;;  %v274_v13 = vld [vmem:[%s371_s1 + $0x8] sm:$0xff]  ;;  %v273_v15 = vld [vmem:[%s371_s1] sm:$0xff] }
   0x6   :  { %156 = vmatpush.bf16.msra.mxu0 %v279_v2  ;;  %v282_v14 = vld [vmem:[%s371_s1 + $0x48] sm:$0xff]  ;;  %v281_v16 = vld [vmem:[%s371_s1 + $0x40] sm:$0xff] }
   0x7   :  { %169 = vmatpush.bf16.msra.mxu1 %v287_v3  ;;  %v289_v21 = vld [vmem:[%s373_s2] ss:$0 sm:$0xff] }
   0x9   :  { %v17_v17 = vld.sshfl [vmem:[#allocation1] sm:$0xff pattern:$0x73625140]  ;;  %v18_v18 = vld.sshfl [vmem:[#allocation1 + $0x8] sm:$0xff pattern:$0x73625140] }
   0xa   :  { %157 = vmatpush.bf16.msra.mxu0 %v278_v5  ;;  %v21_v19 = vpack.c.bf16 %v17_v17, %v17_v17  ;;  %v22_v20 = vpack.c.bf16 %v18_v18, %v18_v18 }
   0xb   :  { %170 = vmatpush.bf16.msra.mxu1 %v286_v6 }
   0xe   :  { %158 = vmatpush.bf16.msra.mxu0 %v277_v7 }
   0xf   :  { %171 = vmatpush.bf16.msra.mxu1 %v285_v8 }
  0x12   :  { %159 = vmatpush.bf16.msra.mxu0 %v276_v9 }
  0x13   :  { %172 = vmatpush.bf16.msra.mxu1 %v284_v10 }
  0x16   :  { %160 = vmatpush.bf16.msra.mxu0 %v275_v11 }
  0x17   :  { %173 = vmatpush.bf16.msra.mxu1 %v283_v12 }
  0x1a   :  { %161 = vmatpush.bf16.msra.mxu0 %v274_v13 }
  0x1b   :  { %174 = vmatpush.bf16.msra.mxu1 %v282_v14 }
  0x1e   :  { %162 = vmatpush.bf16.msra.mxu0 %v273_v15 }
  0x1f   :  { %175 = vmatpush.bf16.msra.mxu1 %v281_v16 }
  0x21   :  { %163 = vmatmul.bf16.vlgmr.msra.gmra.mxu0 %v21_v19 }
  0x22   :  { %176 = vmatmul.bf16.vlgmr.msra.gmra.mxu1 %v22_v20 }
  0x9e   :  { %v164_v22 = vpop.f32.mrf.mxu0 }
  0x9f   :  { %v177_v23 = vpop.f32.mrf.mxu1  ;;  %v165_v24 = vadd.f32 %v289_v21, %v164_v22 }
  0xa1   :  { %v178_v25 = vadd.f32 %v177_v23, %v165_v24 }
  0xa3   :  { %v272_v26 = vmul.f32 -1.442695, %v178_v25 }
  0xa5   :  { %290 = vpow2.f32 %v272_v26 }
  0xa6   :  { %v166_v27 = vpop.f32.mrf.mxu0 }
  0xa7   :  { %v179_v28 = vpop.f32.mrf.mxu1 }
  0xab   :  { %v291_v29 = vpop.eup %290 }
  0xac   :  { %v184_v30 = vadd.f32 1.0, %v291_v29 }
  0xae   :  { %292 = vrcp.f32 %v184_v30  ;;  %v196_v34 = vand.u32 2147483648, %v184_v30  ;;  %v194_v36 = vand.u32 2147483647, %v184_v30  ;;  %vm190_vm1 = vweird.f32 %v184_v30 }
  0xb0   :  { %v197_v38 = vor.u32 1.1754944e-38, %v196_v34  ;;  %vm195_vm3 = vcmp.eq.f32.partialorder %v194_v36, 8.507059e+37 }
  0xb4   :  { %v293_v31 = vpop.eup %292 }
  0xb5   :  { %v186_v32 = vmul.f32 %v293_v31, %v184_v30  ;;  %vm191_vm0 = vweird.f32 %v293_v31 }
  0xb6   :  { %vm192_vm2 = vmor %vm190_vm1, %vm191_vm0 }
  0xb7   :  { %v187_v33 = vsub.f32 1.0, %v186_v32 }
  0xb9   :  { %v188_v35 = vmul.f32 %v293_v31, %v187_v33 }
  0xbb   :  { %v189_v37 = vadd.f32 %v293_v31, %v188_v35 }
  0xbd   :  { %v193_v39 = vsel %vm192_vm2, %v293_v31, %v189_v37 }
  0xbe   :  { %v198_v40 = vsel %vm195_vm3, %v197_v38, %v193_v39 }
  0xbf   :  { %v200_v41 = vmul.f32 %v198_v40, %v178_v25 }
  0xc1   :  { %v201_v42 = vpack.c.bf16 %v200_v41, %v200_v41 }
  0xc3   :  { %203 = vst.msk [vmem:[%s374_s3] sm:$0x1] %vm202_vm4, %v201_v42 }

// kernel: dit_forward.20
= control target key start
LH: loop header
LB: loop body
LE: loop exit
PB: predicated region body
PF: predicated region fallthrough
CT: control target
= control target key end

     0   :  { %vm96_vm4 = vcmask 261120   ;;  %vm159_vm5 = vcmask 1041408   ;;  %vm166_vm6 = vcmask 1043458   ;;  %vm161_vm8 = vcmask 1045508   ;;  %s306_s1 = inlined_call_operand.vmem [shape: bf16[32,448], index: 1, kind: input, shape index: {}]   ;;  %s307_s0 = inlined_call_operand.vmem [shape: bf16[2,32], index: 0, kind: input, shape index: {}]   ;;  %s308_s2 = inlined_call_operand.vmem [shape: f32[1,448], index: 2, kind: input, shape index: {}]   ;;  %s309_s3 = inlined_call_operand.vmem [shape: f32[2,448], index: 3, kind: output, shape index: {}]  }
   0x1   :  { %v195_v0 = vld [vmem:[%s306_s1 + $0x20] sm:$0xf]  ;;  %v219_v1 = vld [vmem:[%s306_s1 + $0x2c] sm:$0xf0]  ;;  %v217_v2 = vld [vmem:[%s306_s1 + $0x24] sm:$0xf] }
   0x2   :  { %v196_v3 = vor.u32 %v219_v1, %v195_v0  ;;  %v197_v4 = vld [vmem:[%s306_s1 + $0x30] sm:$0xf0]  ;;  %v203_v5 = vld [vmem:[%s306_s1 + $0x28] sm:$0xf]  ;;  %v220_v6 = vld [vmem:[%s306_s1 + $0x34] sm:$0xf0] }
   0x3   :  { %v200_v7 = vor.u32 %v217_v2, %v197_v4  ;;  %v204_v8 = vor.u32 %v220_v6, %v203_v5  ;;  %v218_v9 = vld [vmem:[%s306_s1 + $0x2c] sm:$0xf]  ;;  %v205_v10 = vld [vmem:[%s306_s1 + $0x38] sm:$0xf0]  ;;  %v179_v11 = vld [vmem:[%s306_s1] sm:$0xf] }
   0x4   :  { %106 = vmatpush.bf16.msra.mxu0 %v196_v3  ;;  %v208_v12 = vor.u32 %v218_v9, %v205_v10  ;;  %v215_v13 = vld [vmem:[%s306_s1 + $0xc] sm:$0xf0]  ;;  %v213_v14 = vld [vmem:[%s306_s1 + $0x4] sm:$0xf]  ;;  %v181_v15 = vld [vmem:[%s306_s1 + $0x10] sm:$0xf0] }
   0x5   :  { %119 = vmatpush.bf16.msra.mxu1 %v200_v7  ;;  %132 = vmatpush.bf16.msra.mxu2 %v204_v8  ;;  %v180_v16 = vor.u32 %v215_v13, %v179_v11  ;;  %v184_v17 = vor.u32 %v213_v14, %v181_v15  ;;  %v187_v18 = vld [vmem:[%s306_s1 + $0x8] sm:$0xf]  ;;  %v216_v19 = vld [vmem:[%s306_s1 + $0x14] sm:$0xf0]  ;;  %v214_v20 = vld [vmem:[%s306_s1 + $0xc] sm:$0xf] }
   0x6   :  { %145 = vmatpush.bf16.msra.mxu3 %v208_v12  ;;  %v188_v21 = vor.u32 %v216_v19, %v187_v18  ;;  %v189_v22 = vld [vmem:[%s306_s1 + $0x18] sm:$0xf0]  ;;  %v15_v23 = vld [vmem:[%s307_s0] sm:$0x1]  ;;  %vm167_vm7 = vmor %vm166_vm6, %vm159_vm5  ;;  %vm169_vm9 = vcmask 523270   ;;  %vm163_vm11 = vcmask 1043456  }
   0x7   :  { %v192_v24 = vor.u32 %v214_v20, %v189_v22  ;;  %v16_v25 = vunpack.c.l.bf16 %v15_v23  ;;  %v46_v41 = vld [vmem:[%s308_s2] sm:$0xf]  ;;  %vm168_vm10 = vmor %vm161_vm8, %vm167_vm7 }
   0x8   :  { %107 = vmatpush.bf16.msra.mxu0 %v180_v16  ;;  %v49_v43 = vperm.slane %v46_v41, 1  ;;  %v48_v45 = vperm.slane %v46_v41, 0  ;;  %v50_v47 = vperm.slane %v46_v41, 2  ;;  %v51_v48 = vperm.slane %v46_v41, 3  ;;  %vm170_vm12 = vmor %vm169_vm9, %vm168_vm10 }
   0x9   :  { %120 = vmatpush.bf16.msra.mxu1 %v184_v17  ;;  %133 = vmatpush.bf16.msra.mxu2 %v188_v21  ;;  %v176_v26 = vmul.f32 -1.442695, %v16_v25 }
   0xa   :  { %146 = vmatpush.bf16.msra.mxu3 %v192_v24 }
   0xb   :  { %221 = vpow2.f32 %v176_v26 }
  0x11   :  { %v222_v27 = vpop.eup %221 }
  0x12   :  { %v20_v28 = vadd.f32 1.0, %v222_v27 }
  0x14   :  { %223 = vrcp.f32 %v20_v28  ;;  %v32_v31 = vand.u32 2147483648, %v20_v28  ;;  %vm26_vm0 = vweird.f32 %v20_v28  ;;  %v30_v33 = vand.u32 2147483647, %v20_v28 }
  0x16   :  { %v33_v35 = vor.u32 1.1754944e-38, %v32_v31  ;;  %vm31_vm3 = vcmp.eq.f32.partialorder %v30_v33, 8.507059e+37 }
  0x1a   :  { %v224_v29 = vpop.eup %223 }
  0x1b   :  { %v22_v30 = vmul.f32 %v224_v29, %v20_v28  ;;  %vm27_vm1 = vweird.f32 %v224_v29 }
  0x1c   :  { %vm28_vm2 = vmor %vm26_vm0, %vm27_vm1 }
  0x1d   :  { %v23_v32 = vsub.f32 1.0, %v22_v30 }
  0x1f   :  { %v24_v34 = vmul.f32 %v224_v29, %v23_v32 }
  0x21   :  { %v25_v36 = vadd.f32 %v224_v29, %v24_v34 }
  0x23   :  { %v29_v37 = vsel %vm28_vm2, %v224_v29, %v25_v36 }
  0x24   :  { %v34_v38 = vsel %vm31_vm3, %v33_v35, %v29_v37 }
  0x25   :  { %v36_v39 = vmul.f32 %v34_v38, %v16_v25 }
  0x27   :  { %v37_v40 = vpack.c.bf16 %v36_v39, %v36_v39 }
  0x29   :  { %209 = vmatmul.msk.bf16.vlgmr.msra.gmra.mxu0 %vm96_vm4, %v37_v40  ;;  %210 = vmatmul.msk.bf16.vlgmr.msra.gmra.mxu1 %vm96_vm4, %v37_v40 }
  0x2a   :  { %211 = vmatmul.msk.bf16.vlgmr.msra.gmra.mxu2 %vm96_vm4, %v37_v40  ;;  %212 = vmatmul.msk.bf16.vlgmr.msra.gmra.mxu3 %vm96_vm4, %v37_v40 }
  0xa6   :  { %v109_v42 = vpop.f32.mrf.mxu0  ;;  %v122_v44 = vpop.f32.mrf.mxu1 }
  0xa7   :  { %v123_v46 = vadd.f32 %v122_v44, %v49_v43  ;;  %v110_v51 = vadd.f32 %v109_v42, %v48_v45 }
  0xa9   :  { %v156_v52 = vrot.slane %v123_v46, 6 }
  0xab   :  { %v160_v59 = vsel %vm159_vm5, %v110_v51, %v156_v52 }
  0xad   :  { %v135_v49 = vpop.f32.mrf.mxu2  ;;  %v148_v50 = vpop.f32.mrf.mxu3 }
  0xae   :  { %v136_v53 = vadd.f32 %v135_v49, %v50_v47  ;;  %v149_v54 = vadd.f32 %v148_v50, %v51_v48  ;;  %v111_v55 = vpop.f32.mrf.mxu0  ;;  %v124_v56 = vpop.f32.mrf.mxu1 }
  0xb0   :  { %v157_v57 = vrot.slane %v136_v53, 4  ;;  %v158_v58 = vrot.slane %v149_v54, 2 }
  0xb2   :  { %v162_v60 = vsel %vm161_vm8, %v157_v57, %v158_v58 }
  0xb3   :  { %v164_v61 = vsel %vm163_vm11, %v160_v59, %v162_v60 }
  0xb4   :  { %171 = vst.msk [vmem:[%s309_s3] sm:$0xff] %vm170_vm12, %v164_v61 }
  0xb5   :  { %v137_v62 = vpop.f32.mrf.mxu2  ;;  %v150_v63 = vpop.f32.mrf.mxu3 }

// kernel: dit_forward.21
= control target key start
LH: loop header
LB: loop body
LE: loop exit
PB: predicated region body
PF: predicated region fallthrough
CT: control target
= control target key end

     0   :  { %s811_s21 = smov 0   ;;  %s813_s22 = smov 0   ;;  %s883_s0 = inlined_call_operand.vmem [shape: bf16[2,16,32], index: 0, kind: input, shape index: {}]   ;;  %s884_s1 = inlined_call_operand.vmem [shape: f32[2,2,32], index: 1, kind: input, shape index: {}]   ;;  %s885_s2 = inlined_call_operand.vmem [shape: bf16[32,96], index: 2, kind: input, shape index: {}]   ;;  %s886_s3 = inlined_call_operand.vmem [shape: f32[1,96], index: 3, kind: input, shape index: {}]   ;;  %s887_s4 = inlined_call_operand.vmem [shape: bf16[2,16,32], index: 4, kind: output, shape index: {0}]   ;;  %s888_s5 = inlined_call_operand.vmem [shape: bf16[2,16,32], index: 5, kind: output, shape index: {1}]   ;;  %s889_s6 = inlined_call_operand.vmem [shape: bf16[2,16,32], index: 6, kind: output, shape index: {2}]  }
   0x1   :  { %s815_s23 = smov 0  }
   0x2 LB: > { %s29_s24 = sadd.s32 1, %s767_s22  ;;  %p684_p0 = scmp.ge.s32.totalorder %s771_s23, 1  ;;  %s771_s23 = sphi %s815_s23, %s17_s23   ;;  %s767_s22 = sphi %s813_s22, %s891_s22   ;;  %s763_s21 = sphi %s811_s21, %s890_s21  }
   0x3   : > { %p31_p1 = scmp.ge.s32.totalorder %s29_s24, 2  ;;  %p251_p2 = scmp.lt.s32.totalorder %s771_s23, 3 }
   0x5   : > { %s893_s24 = smov (%p31_p1, %s29_s24), 0  ;;  %p252_p3 = pnand %p684_p0, %p251_p2 }
   0x6   : > { %p312_p4 = scmp.lt.s32.totalorder (!%p252_p3), %s763_s21, 1  ;;  %s774_s18 = smov (!%p252_p3), 64  }
   0x7   : > { %255 = sbr.rel (%p252_p3) target bundleno = 550 (0x226), region = 36  ;;  %s775_s19 = smov (!%p252_p3), 96  }
   0xc   : > { %s895_s21 = smov (!%p312_p4, %s763_s21), 1  ;;  %vm361_vm0 = vcmask 261120   ;;  %v773_v5 = vmov 32.0   ;;  %v710_v22 = vld [vmem:[%s885_s2 + $0x8] sm:$0xff]  ;;  %v709_v24 = vld [vmem:[%s885_s2] sm:$0xff]  ;;  %vm460_vm8 = vcmask 257024  }
   0xd   : > { %s832_s25 = sshll.u32 %s895_s21, 3  ;;  %743 = vrcp.f32 %v773_v5  ;;  %450 = vmatpush.bf16.msra.mxu0 %v710_v22  ;;  %s687_s9 = sshll.u32 %s895_s21, 1  ;;  %v742_v55 = vld [vmem:[%s886_s3] ss:$0 sm:$0xff] }
   0xe   : > { %s319_s28 = scalar_lea.vmem %s883_s0, %s832_s25  ;;  %s324_s12 = scalar_lea.vmem %s884_s1, %s687_s9 }
   0xf   : > { %v712_v0 = vld [vmem:[%s319_s28] sm:$0xff]   ;;  %s333_s17 = scalar_lea.vmem %s887_s4, %s832_s25  ;;  %s343_s26 = scalar_lea.vmem %s888_s5, %s832_s25 }
  0x10   : > { %v713_v1 = vunpack.c.l.bf16 %v712_v0  ;;  %v714_v3 = vunpack.c.h.bf16 %v712_v0  ;;  %v360_v38 = vld [vmem:[%s324_s12] sm:$0x3]  ;;  %s353_s29 = scalar_lea.vmem %s889_s6, %s832_s25 }
  0x11   : > { %451 = vmatpush.bf16.msra.mxu0 %v709_v24  ;;  %v413_v40 = vadd.f32 1.0, %v360_v38  ;;  %v417_v50 = vperm.slane %v360_v38, 0 }
  0x12   : > { %v362_v2 = vsel %vm361_vm0, %v713_v1, 0.0  ;;  %v365_v4 = vsel %vm361_vm0, %v714_v3, 0.0 }
  0x13   : > { %363 = vadd.xlane.f32.xlu0 %v362_v2  ;;  %v744_v6 = vpop.eup %743  ;;  %v414_v45 = vperm.slane %v413_v40, 1 }
  0x14   : > { %v369_v7 = vmul.f32 32.0, %v744_v6  ;;  %vm373_vm1 = vweird.f32 %v744_v6 }
  0x16   : > { %v370_v8 = vsub.f32 1.0, %v369_v7 }
  0x18   : > { %v371_v9 = vmul.f32 %v744_v6, %v370_v8 }
  0x1a   : > { %v372_v10 = vadd.f32 %v744_v6, %v371_v9 }
  0x1b   : > { %366 = vadd.xlane.f32.xlu0 %v365_v4 }
  0x1c   : > { %v374_v11 = vsel %vm373_vm1, %v744_v6, %v372_v10 }
  0x86   : > { %v364_v12 = vpop.xlane.xlu0 %363 }
  0x87   : > { %v375_v13 = vmul.f32 %v374_v11, %v364_v12 }
  0x89   : > { %v377_v14 = vsub.f32 %v713_v1, %v375_v13 }
  0x8b   : > { %v379_v15 = vmul.f32 %v377_v14, %v377_v14 }
  0x8d   : > { %v381_v16 = vsel %vm361_vm0, %v379_v15, 0.0 }
  0x8e   : > { %382 = vadd.xlane.f32.xlu1 %v381_v16  ;;  %v367_v17 = vpop.xlane.xlu0 %366 }
  0x8f   : > { %v376_v18 = vmul.f32 %v374_v11, %v367_v17 }
  0x91   : > { %v378_v19 = vsub.f32 %v714_v3, %v376_v18 }
  0x93   : > { %v380_v20 = vmul.f32 %v378_v19, %v378_v19 }
  0x95   : > { %v384_v21 = vsel %vm361_vm0, %v380_v20, 0.0 }
  0x96   : > { %385 = vadd.xlane.f32.xlu1 %v384_v21 }
 0x101   : > { %v383_v23 = vpop.xlane.xlu1 %382 }
 0x102   : > { %v387_v25 = vmul.f32 %v383_v23, %v374_v11 }
 0x104   : > { %v389_v26 = vadd.f32 1e-06, %v387_v25 }
 0x106   : > { %745 = vrsqrt.f32 %v389_v26  ;;  %vm397_vm3 = vweird.f32 %v389_v26 }
 0x109   : > { %v386_v27 = vpop.xlane.xlu1 %385 }
 0x10a   : > { %v388_v28 = vmul.f32 %v386_v27, %v374_v11 }
 0x10c   : > { %v746_v29 = vpop.eup %745  ;;  %v390_v30 = vadd.f32 1e-06, %v388_v28 }
 0x10d   : > { %v392_v31 = vmul.f32 %v746_v29, %v389_v26  ;;  %vm398_vm2 = vweird.f32 %v746_v29 }
 0x10e   : > { %747 = vrsqrt.f32 %v390_v30  ;;  %vm399_vm4 = vmor %vm397_vm3, %vm398_vm2  ;;  %vm407_vm6 = vweird.f32 %v390_v30 }
 0x10f   : > { %v393_v32 = vmul.f32 %v746_v29, %v392_v31 }
 0x111   : > { %v394_v33 = vmul.f32 0.5, %v393_v32 }
 0x113   : > { %v395_v34 = vsub.f32 1.5, %v394_v33 }
 0x114   : > { %v748_v35 = vpop.eup %747 }
 0x115   : > { %v396_v36 = vmul.f32 %v746_v29, %v395_v34  ;;  %v402_v37 = vmul.f32 %v748_v35, %v390_v30  ;;  %vm408_vm5 = vweird.f32 %v748_v35 }
 0x116   : > { %vm409_vm7 = vmor %vm407_vm6, %vm408_vm5 }
 0x117   : > { %v403_v39 = vmul.f32 %v748_v35, %v402_v37  ;;  %v400_v41 = vsel %vm399_vm4, %v746_v29, %v396_v36 }
 0x118   : > { %v411_v44 = vmul.f32 %v400_v41, %v377_v14 }
 0x119   : > { %v404_v42 = vmul.f32 0.5, %v403_v39 }
 0x11a   : > { %v415_v49 = vmul.f32 %v414_v45, %v411_v44 }
 0x11b   : > { %v405_v43 = vsub.f32 1.5, %v404_v42 }
 0x11c   : > { %v418_v52 = vadd.f32 %v417_v50, %v415_v49 }
 0x11d   : > { %v406_v46 = vmul.f32 %v748_v35, %v405_v43 }
 0x11f   : > { %v410_v47 = vsel %vm409_vm7, %v748_v35, %v406_v46 }
 0x120   : > { %v412_v48 = vmul.f32 %v410_v47, %v378_v19 }
 0x122   : > { %v416_v51 = vmul.f32 %v414_v45, %v412_v48 }
 0x124   : > { %v419_v53 = vadd.f32 %v417_v50, %v416_v51 }
 0x126   : > { %v420_v54 = vpack.c.bf16 %v419_v53, %v418_v52 }
 0x128   : > { %702 = vmatmul.msk.bf16.vlgmr.msra.gmra.mxu0 %vm361_vm0, %v420_v54 }
 0x1a5   : > { %v453_v56 = vpop.f32.mrf.mxu0 }
 0x1a6   : > { %v454_v57 = vadd.f32 %v742_v55, %v453_v56 }
 0x1a8   : > { %v458_v58 = vpack.c.bf16 %v454_v57, %v454_v57 }
 0x1aa   : > { %461 = vst.msk [vmem:[%s333_s17] sm:$0xf] %vm460_vm8, %v458_v58  ;;  %473 = vrot.lane.b32.xlu0 %v458_v58, %s774_s18  ;;  %465 = vrot.lane.b32.xlu2 %v458_v58, %s775_s19 }
 0x1ad   : > { %v455_v59 = vpop.f32.mrf.mxu0 }
 0x1ae   : > { %v456_v60 = vadd.f32 %v742_v55, %v455_v59 }
 0x1b0   : > { %v459_v61 = vpack.c.bf16 %v456_v60, %v456_v60 }
 0x1b2   : > { %462 = vst.msk [vmem:[%s333_s17 + $0x4] sm:$0xf] %vm460_vm8, %v459_v61  ;;  %475 = vrot.lane.b32.xlu1 %v459_v61, %s774_s18  ;;  %467 = vrot.lane.b32.xlu2 %v459_v61, %s775_s19 }
 0x204   : > { %v466_v62 = vpop.permute.xlu2 %465 }
 0x205   : > { %471 = vst.msk [vmem:[%s343_s26] sm:$0xf] %vm460_vm8, %v466_v62 }
 0x20c   : > { %v468_v63 = vpop.permute.xlu2 %467 }
 0x20d   : > { %472 = vst.msk [vmem:[%s343_s26 + $0x4] sm:$0xf] %vm460_vm8, %v468_v63 }
 0x21c   : > { %v474_v0 = vpop.permute.xlu0 %473 }
 0x21d   : > { %479 = vst.msk [vmem:[%s353_s29] sm:$0xf] %vm460_vm8, %v474_v0 }
 0x224   : > { %v476_v1 = vpop.permute.xlu1 %475 }
 0x225   : > { %480 = vst.msk [vmem:[%s353_s29 + $0x4] sm:$0xf] %vm460_vm8, %v476_v1 }
 0x226 PF: > { %s17_s23 = sadd.s32 1, %s771_s23   ;;  %s890_s21 = smov %s767_s22 }
 0x227   : > { %p14_p5 = scmp.ge.s32.totalorder %s17_s23, 4   ;;  %s891_s22 = smov %s893_s24 }
 0x229   :  { %16 = sbr.rel (!%p14_p5) target bundleno = 2 (0x2), region = 93 }

// kernel: dit_forward.23
= control target key start
LH: loop header
LB: loop body
LE: loop exit
PB: predicated region body
PF: predicated region fallthrough
CT: control target
= control target key end

     0   :  { %s723_s18 = smov 0   ;;  %s725_s19 = smov 0   ;;  %s771_s0 = inlined_call_operand.vmem [shape: bf16[2,16,32], index: 0, kind: input, shape index: {}]   ;;  %s772_s1 = inlined_call_operand.vmem [shape: bf16[2,16,32], index: 1, kind: input, shape index: {}, may-alias: {1,5}]   ;;  %s773_s2 = inlined_call_operand.vmem [shape: f32[2,1,32], index: 2, kind: input, shape index: {}]   ;;  %s774_s3 = inlined_call_operand.vmem [shape: bf16[32,32], index: 3, kind: input, shape index: {}]   ;;  %s775_s4 = inlined_call_operand.vmem [shape: f32[1,32], index: 4, kind: input, shape index: {}]   ;;  %s776_s5 = inlined_call_operand.vmem [shape: bf16[2,16,32], index: 5, kind: output, shape index: {}, may-alias: {1,5}]  }
   0x1   :  { %s727_s20 = smov 0  }
   0x2 LB: > { %s30_s21 = sadd.s32 1, %s687_s19  ;;  %p611_p0 = scmp.ge.s32.totalorder %s691_s20, 1  ;;  %s691_s20 = sphi %s727_s20, %s15_s20   ;;  %s687_s19 = sphi %s725_s19, %s778_s19   ;;  %s683_s18 = sphi %s723_s18, %s777_s18  }
   0x3   : > { %p32_p1 = scmp.ge.s32.totalorder %s30_s21, 2  ;;  %p269_p2 = scmp.lt.s32.totalorder %s691_s20, 3 }
   0x5   : > { %s780_s21 = smov (%p32_p1, %s30_s21), 0  ;;  %p270_p3 = pnand %p611_p0, %p269_p2 }
   0x6   : > { %p334_p4 = scmp.lt.s32.totalorder (!%p270_p3), %s683_s18, 1 }
   0x7   : > { %273 = sbr.rel (%p270_p3) target bundleno = 163 (0xa3), region = 40 }
   0xc   : > { %v638_v0 = vld [vmem:[%s774_s3 + $0x8] sm:$0xff]  ;;  %v637_v1 = vld [vmem:[%s774_s3] sm:$0xff]  ;;  %s782_s18 = smov (!%p334_p4, %s683_s18), 1  ;;  %vm410_vm0 = vcmask 261120   ;;  %vm442_vm1 = vcmask 257024  }
   0xd   : > { %420 = vmatpush.bf16.msra.mxu0 %v638_v0  ;;  %s633_s26 = sshll.u32 %s782_s18, 3  ;;  %s361_s29 = scalar_lea.vmem %s773_s2, %s782_s18  ;;  %v667_v3 = vld [vmem:[%s775_s4] ss:$0 sm:$0xff] }
   0xe   : > { %s341_s7 = scalar_lea.vmem %s771_s0, %s633_s26  ;;  %s354_s10 = scalar_lea.vmem %s772_s1, %s633_s26  ;;  %v668_v5 = vld [vmem:[%s361_s29] ss:$0 sm:$0xff] }
   0xf   : > { %v636_v2 = vld [vmem:[%s341_s7] sm:$0xff]  ;;  %s380_s15 = scalar_lea.vmem %s776_s5, %s633_s26 }
  0x10   : > { %v640_v4 = vld [vmem:[%s354_s10] sm:$0xff]  }
  0x11   : > { %421 = vmatpush.bf16.msra.mxu0 %v637_v1  ;;  %v641_v8 = vunpack.c.l.bf16 %v640_v4  ;;  %v642_v14 = vunpack.c.h.bf16 %v640_v4 }
  0x14   : > { %630 = vmatmul.msk.bf16.vlgmr.msra.gmra.mxu0 %vm410_vm0, %v636_v2 }
  0x91   : > { %v423_v6 = vpop.f32.mrf.mxu0 }
  0x92   : > { %v424_v7 = vadd.f32 %v667_v3, %v423_v6 }
  0x94   : > { %v436_v9 = vmul.f32 %v668_v5, %v424_v7 }
  0x96   : > { %v438_v10 = vadd.f32 %v641_v8, %v436_v9 }
  0x98   : > { %v440_v11 = vpack.c.bf16 %v438_v10, %v438_v10 }
  0x99   : > { %v425_v12 = vpop.f32.mrf.mxu0 }
  0x9a   : > { %443 = vst.msk [vmem:[%s380_s15] sm:$0xf] %vm442_vm1, %v440_v11  ;;  %v426_v13 = vadd.f32 %v667_v3, %v425_v12 }
  0x9c   : > { %v437_v15 = vmul.f32 %v668_v5, %v426_v13 }
  0x9e   : > { %v439_v16 = vadd.f32 %v642_v14, %v437_v15 }
  0xa0   : > { %v441_v17 = vpack.c.bf16 %v439_v16, %v439_v16 }
  0xa2   : > { %444 = vst.msk [vmem:[%s380_s15 + $0x4] sm:$0xf] %vm442_vm1, %v441_v17 }
  0xa3 PF: > { %s15_s20 = sadd.s32 1, %s691_s20   ;;  %s777_s18 = smov %s687_s19 }
  0xa4   : > { %p12_p5 = scmp.ge.s32.totalorder %s15_s20, 4   ;;  %s778_s19 = smov %s780_s21 }
  0xa6   :  { %14 = sbr.rel (!%p12_p5) target bundleno = 2 (0x2), region = 82 }

// kernel: dit_forward.24
= control target key start
LH: loop header
LB: loop body
LE: loop exit
PB: predicated region body
PF: predicated region fallthrough
CT: control target
= control target key end

     0   :  { %s686_s15 = smov 0   ;;  %s688_s16 = smov 0   ;;  %s744_s0 = inlined_call_operand.vmem [shape: bf16[2,16,32], index: 0, kind: input, shape index: {}]   ;;  %s745_s1 = inlined_call_operand.vmem [shape: f32[2,2,32], index: 1, kind: input, shape index: {}]   ;;  %s746_s2 = inlined_call_operand.vmem [shape: bf16[32,128], index: 2, kind: input, shape index: {}]   ;;  %s747_s3 = inlined_call_operand.vmem [shape: f32[1,128], index: 3, kind: input, shape index: {}]   ;;  %s748_s4 = inlined_call_operand.vmem [shape: bf16[2,16,128], index: 4, kind: output, shape index: {}]  }
   0x1   :  { %s690_s17 = smov 0  }
   0x2 LB: > { %s29_s18 = sadd.s32 1, %s654_s16  ;;  %p570_p0 = scmp.ge.s32.totalorder %s658_s17, 1  ;;  %s658_s17 = sphi %s690_s17, %s14_s17   ;;  %s654_s16 = sphi %s688_s16, %s750_s16   ;;  %s650_s15 = sphi %s686_s15, %s749_s15  }
   0x3   : > { %p31_p1 = scmp.ge.s32.totalorder %s29_s18, 2  ;;  %p218_p2 = scmp.lt.s32.totalorder %s658_s17, 3 }
   0x5   : > { %s752_s18 = smov (%p31_p1, %s29_s18), 0  ;;  %p219_p3 = pnand %p570_p0, %p218_p2 }
   0x6   : > { %p267_p4 = scmp.lt.s32.totalorder (!%p219_p3), %s650_s15, 1 }
   0x7   : > { %222 = sbr.rel (%p219_p3) target bundleno = 458 (0x1ca), region = 36 }
   0xc   : > { %s754_s15 = smov (!%p267_p4, %s650_s15), 1  ;;  %vm306_vm0 = vcmask 261120   ;;  %v660_v5 = vmov 32.0   ;;  %v590_v22 = vld [vmem:[%s746_s2 + $0x8] sm:$0xff]  ;;  %v589_v24 = vld [vmem:[%s746_s2] sm:$0xff] }
   0xd   : > { %s587_s19 = sshll.u32 %s754_s15, 3  ;;  %626 = vrcp.f32 %v660_v5  ;;  %395 = vmatpush.bf16.msra.mxu0 %v590_v22  ;;  %s573_s27 = sshll.u32 %s754_s15, 1  ;;  %v625_v55 = vld [vmem:[%s747_s3] ss:$0 sm:$0xff] }
   0xe   : > { %s274_s22 = scalar_lea.vmem %s744_s0, %s587_s19  ;;  %s279_s30 = scalar_lea.vmem %s745_s1, %s573_s27 }
   0xf   : > { %v592_v0 = vld [vmem:[%s274_s22] sm:$0xff]   ;;  %s298_s9 = scalar_lea.vmem %s748_s4, %s587_s19 }
  0x10   : > { %v593_v1 = vunpack.c.l.bf16 %v592_v0  ;;  %v594_v3 = vunpack.c.h.bf16 %v592_v0  ;;  %v305_v36 = vld [vmem:[%s279_s30] sm:$0x3] }
  0x11   : > { %396 = vmatpush.bf16.msra.mxu0 %v589_v24  ;;  %v358_v40 = vadd.f32 1.0, %v305_v36  ;;  %v362_v50 = vperm.slane %v305_v36, 0 }
  0x12   : > { %v307_v2 = vsel %vm306_vm0, %v593_v1, 0.0  ;;  %v310_v4 = vsel %vm306_vm0, %v594_v3, 0.0 }
  0x13   : > { %308 = vadd.xlane.f32.xlu0 %v307_v2  ;;  %v627_v6 = vpop.eup %626  ;;  %v359_v45 = vperm.slane %v358_v40, 1 }
  0x14   : > { %v314_v7 = vmul.f32 32.0, %v627_v6  ;;  %vm318_vm1 = vweird.f32 %v627_v6 }
  0x16   : > { %v315_v8 = vsub.f32 1.0, %v314_v7 }
  0x18   : > { %v316_v9 = vmul.f32 %v627_v6, %v315_v8 }
  0x1a   : > { %v317_v10 = vadd.f32 %v627_v6, %v316_v9 }
  0x1b   : > { %311 = vadd.xlane.f32.xlu0 %v310_v4 }
  0x1c   : > { %v319_v11 = vsel %vm318_vm1, %v627_v6, %v317_v10 }
  0x86   : > { %v309_v12 = vpop.xlane.xlu0 %308 }
  0x87   : > { %v320_v13 = vmul.f32 %v319_v11, %v309_v12 }
  0x89   : > { %v322_v14 = vsub.f32 %v593_v1, %v320_v13 }
  0x8b   : > { %v324_v15 = vmul.f32 %v322_v14, %v322_v14 }
  0x8d   : > { %v326_v16 = vsel %vm306_vm0, %v324_v15, 0.0 }
  0x8e   : > { %327 = vadd.xlane.f32.xlu1 %v326_v16  ;;  %v312_v17 = vpop.xlane.xlu0 %311 }
  0x8f   : > { %v321_v18 = vmul.f32 %v319_v11, %v312_v17 }
  0x91   : > { %v323_v19 = vsub.f32 %v594_v3, %v321_v18 }
  0x93   : > { %v325_v20 = vmul.f32 %v323_v19, %v323_v19 }
  0x95   : > { %v329_v21 = vsel %vm306_vm0, %v325_v20, 0.0 }
  0x96   : > { %330 = vadd.xlane.f32.xlu1 %v329_v21 }
 0x101   : > { %v328_v23 = vpop.xlane.xlu1 %327 }
 0x102   : > { %v332_v25 = vmul.f32 %v328_v23, %v319_v11 }
 0x104   : > { %v334_v26 = vadd.f32 1e-06, %v332_v25 }
 0x106   : > { %628 = vrsqrt.f32 %v334_v26  ;;  %vm342_vm3 = vweird.f32 %v334_v26 }
 0x109   : > { %v331_v27 = vpop.xlane.xlu1 %330 }
 0x10a   : > { %v333_v28 = vmul.f32 %v331_v27, %v319_v11 }
 0x10c   : > { %v629_v29 = vpop.eup %628  ;;  %v335_v30 = vadd.f32 1e-06, %v333_v28 }
 0x10d   : > { %v337_v31 = vmul.f32 %v629_v29, %v334_v26  ;;  %vm343_vm2 = vweird.f32 %v629_v29 }
 0x10e   : > { %630 = vrsqrt.f32 %v335_v30  ;;  %vm344_vm4 = vmor %vm342_vm3, %vm343_vm2  ;;  %vm352_vm6 = vweird.f32 %v335_v30 }
 0x10f   : > { %v338_v32 = vmul.f32 %v629_v29, %v337_v31 }
 0x111   : > { %v339_v33 = vmul.f32 0.5, %v338_v32 }
 0x113   : > { %v340_v34 = vsub.f32 1.5, %v339_v33 }
 0x114   : > { %v631_v35 = vpop.eup %630 }
 0x115   : > { %v341_v37 = vmul.f32 %v629_v29, %v340_v34  ;;  %v347_v38 = vmul.f32 %v631_v35, %v335_v30  ;;  %vm353_vm5 = vweird.f32 %v631_v35 }
 0x116   : > { %vm354_vm7 = vmor %vm352_vm6, %vm353_vm5 }
 0x117   : > { %v348_v39 = vmul.f32 %v631_v35, %v347_v38  ;;  %v345_v41 = vsel %vm344_vm4, %v629_v29, %v341_v37 }
 0x118   : > { %v356_v44 = vmul.f32 %v345_v41, %v322_v14 }
 0x119   : > { %v349_v42 = vmul.f32 0.5, %v348_v39 }
 0x11a   : > { %v360_v49 = vmul.f32 %v359_v45, %v356_v44 }
 0x11b   : > { %v350_v43 = vsub.f32 1.5, %v349_v42 }
 0x11c   : > { %v363_v52 = vadd.f32 %v362_v50, %v360_v49 }
 0x11d   : > { %v351_v46 = vmul.f32 %v631_v35, %v350_v43 }
 0x11f   : > { %v355_v47 = vsel %vm354_vm7, %v631_v35, %v351_v46 }
 0x120   : > { %v357_v48 = vmul.f32 %v355_v47, %v323_v19 }
 0x122   : > { %v361_v51 = vmul.f32 %v359_v45, %v357_v48 }
 0x124   : > { %v364_v53 = vadd.f32 %v362_v50, %v361_v51 }
 0x126   : > { %v365_v54 = vpack.c.bf16 %v364_v53, %v363_v52 }
 0x128   : > { %584 = vmatmul.msk.bf16.vlgmr.msra.gmra.mxu0 %vm306_vm0, %v365_v54 }
 0x1a5   : > { %v398_v56 = vpop.f32.mrf.mxu0 }
 0x1a6   : > { %v399_v57 = vadd.f32 %v625_v55, %v398_v56 }
 0x1a8   : > { %v403_v58 = vmul.f32 %v399_v57, %v399_v57 }
 0x1aa   : > { %v405_v59 = vmul.f32 %v403_v58, %v399_v57 }
 0x1ac   : > { %v407_v60 = vmul.f32 0.044715, %v405_v59 }
 0x1ad   : > { %v400_v61 = vpop.f32.mrf.mxu0 }
 0x1ae   : > { %v409_v62 = vadd.f32 %v407_v60, %v399_v57  ;;  %v401_v63 = vadd.f32 %v625_v55, %v400_v61 }
 0x1b0   : > { %v411_v0 = vmul.f32 0.7978846, %v409_v62  ;;  %v404_v1 = vmul.f32 %v401_v63, %v401_v63 }
 0x1b2   : > { %v406_v2 = vmul.f32 %v404_v1, %v401_v63  ;;  %632 = vtanh.f32 %v411_v0 }
 0x1b4   : > { %v408_v3 = vmul.f32 0.044715, %v406_v2 }
 0x1b6   : > { %v410_v4 = vadd.f32 %v408_v3, %v401_v63 }
 0x1b8   : > { %v412_v5 = vmul.f32 0.7978846, %v410_v4  ;;  %v633_v6 = vpop.eup %632 }
 0x1b9   : > { %v415_v7 = vadd.f32 1.0, %v633_v6 }
 0x1ba   : > { %634 = vtanh.f32 %v412_v5 }
 0x1bb   : > { %v417_v9 = vmul.f32 0.5, %v415_v7 }
 0x1bd   : > { %v419_v12 = vmul.f32 %v417_v9, %v399_v57 }
 0x1c0   : > { %v635_v8 = vpop.eup %634 }
 0x1c1   : > { %v416_v10 = vadd.f32 1.0, %v635_v8 }
 0x1c3   : > { %v418_v11 = vmul.f32 0.5, %v416_v10 }
 0x1c5   : > { %v420_v13 = vmul.f32 %v418_v11, %v401_v63 }
 0x1c7   : > { %v598_v14 = vpack.c.bf16 %v420_v13, %v419_v12 }
 0x1c9   : > { %599 = vst [vmem:[%s298_s9] sm:$0xff] %v598_v14  }
 0x1ca PF: > { %s14_s17 = sadd.s32 1, %s658_s17   ;;  %s749_s15 = smov %s654_s16 }
 0x1cb   : > { %p11_p5 = scmp.ge.s32.totalorder %s14_s17, 4   ;;  %s750_s16 = smov %s752_s18 }
 0x1cd   :  { %13 = sbr.rel (!%p11_p5) target bundleno = 2 (0x2), region = 75 }

// kernel: dit_forward.22
= control target key start
LH: loop header
LB: loop body
LE: loop exit
PB: predicated region body
PF: predicated region fallthrough
CT: control target
= control target key end

     0   :  { %s750_s12 = smov 0   ;;  %s837_s0 = inlined_call_operand.vmem [shape: bf16[2,16,32], index: 0, kind: input, shape index: {}]   ;;  %s838_s1 = inlined_call_operand.vmem [shape: bf16[2,16,32], index: 1, kind: input, shape index: {}]   ;;  %s839_s2 = inlined_call_operand.vmem [shape: bf16[2,16,32], index: 2, kind: input, shape index: {}]   ;;  %s840_s3 = inlined_call_operand.vmem [shape: bf16[2,16,32], index: 3, kind: output, shape index: {}]  }
   0x1 LB: > { %s628_s13 = sadd.s32 4294967295, %s722_s12   ;;  %p632_p0 = scmp.ge.s32.totalorder %s722_s12, 1  ;;  %s722_s12 = sphi %s750_s12, %s13_s12  }
   0x2   : > { %p157_p1 = scmp.lt.s32.totalorder %s722_s12, 3 }
   0x4   : > { %p158_p2 = pnand %p632_p0, %p157_p1 }
   0x5   : > { %p191_p3 = scmp.lt.s32.totalorder (!%p158_p2), %s628_s13, 1  ;;  %s724_s21 = smov (!%p158_p2), 120  }
   0x6   : > { %161 = sbr.rel (%p158_p2) target bundleno = 1079 (0x437), region = 32  ;;  %s725_s22 = smov (!%p158_p2), 104  }
   0x7   : > { %s726_s23 = smov (!%p158_p2), 112   ;;  %s727_s27 = smov (!%p158_p2), 8  }
   0x8   : > { %s728_s28 = smov (!%p158_p2), 16   ;;  %s729_s29 = smov (!%p158_p2), 24  }
   0xb   : > { %s842_s13 = smov (!%p191_p3, %s628_s13), 1  ;;  %vm228_vm0 = vcmask 64512   ;;  %vm249_vm1 = vcmask 130048   ;;  %vm536_vm2 = vcmask 195584   ;;  %vm546_vm3 = vcmask 257024  }
   0xc   : > { %s758_s14 = sshll.u32 %s842_s13, 3 }
   0xd   : > { %s200_s17 = scalar_lea.vmem %s838_s1, %s758_s14  ;;  %s195_s20 = scalar_lea.vmem %s837_s0, %s758_s14 }
   0xe   : > { %v668_v0 = vld [vmem:[%s200_s17] sm:$0xff]  ;;  %s205_s26 = scalar_lea.vmem %s839_s2, %s758_s14  ;;  %s210_s5 = scalar_lea.vmem %s840_s3, %s758_s14 }
   0xf   : > { %v667_v1 = vld [vmem:[%s195_s20] sm:$0xff]  ;;  %v233_v2 = vsel %vm228_vm0, %v668_v0, 0  ;;  %300 = vrot.lane.b32.xlu1 %v668_v0, %s724_s21 }
  0x10   : > { %298 = vrot.lane.b32.xlu2 %v667_v1, %s724_s21  ;;  %242 = vmatpush.bf16.xpose.msra.mxu0 %v233_v2  ;;  %v789_v26 = vld [vmem:[%s205_s26] sm:$0xff] }
  0x11   : > { %289 = vmatpush.bf16.msra.mxu1 %v789_v26 }
  0x17   : > { %649 = vmatmul.msk.bf16.vlgmr.msra.gmra.mxu0 %vm228_vm0, %v667_v1 }
  0x18   : > { %438 = vrot.lane.b32.xlu2 %v668_v0, %s725_s22 }
  0x6a   : > { %v299_v5 = vpop.permute.xlu2 %298 }
  0x72   : > { %v439_v18 = vpop.permute.xlu2 %438 }
  0x73   : > { %v444_v20 = vsel %vm228_vm0, %v439_v18, 0 }
  0x74   : > { %453 = vmatpush.bf16.xpose.msrb.mxu0 %v444_v20 }
  0x81   : > { %v301_v3 = vpop.permute.xlu1 %300 }
  0x82   : > { %v306_v4 = vsel %vm228_vm0, %v301_v3, 0 }
  0x83   : > { %315 = vmatpush.bf16.xpose.msra.mxu2 %v306_v4 }
  0x8a   : > { %655 = vmatmul.msk.bf16.vlgmr.msra.gmra.mxu2 %vm228_vm0, %v299_v5 }
  0x94   : > { %v244_v6 = vpop.f32.mrf.mxu0 }
  0x95   : > { %v250_v7 = vsel %vm249_vm1, %v244_v6, -inf }
  0x96   : > { %251 = vmax.xlane.f32.xlu0 %v250_v7 }
  0x9c   : > { %v246_v8 = vpop.f32.mrf.mxu0 }
  0x9d   : > { %v253_v9 = vsel %vm249_vm1, %v246_v8, -inf }
  0x9e   : > { %254 = vmax.xlane.f32.xlu0 %v253_v9 }
  0xb2   : > { %369 = vrot.lane.b32.xlu0 %v668_v0, %s726_s23 }
  0xba   : > { %367 = vrot.lane.b32.xlu0 %v667_v1, %s726_s23 }
 0x109   : > { %v252_v10 = vpop.xlane.xlu0 %251 }
 0x10a   : > { %v256_v11 = vsub.f32 %v244_v6, %v252_v10 }
 0x10c   : > { %v258_v12 = vmul.f32 1.442695, %v256_v11 }
 0x10d   : > { %v317_v19 = vpop.f32.mrf.mxu2 }
 0x10e   : > { %684 = vpow2.f32 %v258_v12  ;;  %v322_v21 = vsel %vm249_vm1, %v317_v19, -inf }
 0x10f   : > { %323 = vmax.xlane.f32.xlu0 %v322_v21 }
 0x111   : > { %v255_v13 = vpop.xlane.xlu0 %254 }
 0x112   : > { %v257_v14 = vsub.f32 %v246_v8, %v255_v13 }
 0x114   : > { %v685_v15 = vpop.eup %684  ;;  %v260_v16 = vmul.f32 1.442695, %v257_v14 }
 0x115   : > { %v262_v17 = vsel %vm249_vm1, %v685_v15, 0.0  ;;  %v319_v24 = vpop.f32.mrf.mxu2 }
 0x116   : > { %686 = vpow2.f32 %v260_v16  ;;  %263 = vadd.xlane.f32.xlu1 %v262_v17  ;;  %v325_v25 = vsel %vm249_vm1, %v319_v24, -inf }
 0x11c   : > { %v687_v22 = vpop.eup %686 }
 0x11d   : > { %v265_v23 = vsel %vm249_vm1, %v687_v22, 0.0 }
 0x11e   : > { %266 = vadd.xlane.f32.xlu2 %v265_v23 }
 0x124   : > { %v370_v27 = vpop.permute.xlu0 %369 }
 0x125   : > { %v375_v28 = vsel %vm228_vm0, %v370_v27, 0 }
 0x126   : > { %384 = vmatpush.bf16.xpose.msrb.mxu1 %v375_v28 }
 0x12c   : > { %v368_v37 = vpop.permute.xlu0 %367 }
 0x136   : > { %436 = vrot.lane.b32.xlu2 %v667_v1, %s725_s22 }
 0x15f   : > { %326 = vmax.xlane.f32.xlu2 %v325_v25 }
 0x177   : > { %345 = vrot.lane.b32.xlu2 %v789_v26, %s724_s21 }
 0x182   : > { %v324_v53 = vpop.xlane.xlu0 %323 }
 0x183   : > { %v328_v55 = vsub.f32 %v317_v19, %v324_v53 }
 0x185   : > { %v330_v58 = vmul.f32 1.442695, %v328_v55 }
 0x189   : > { %v264_v29 = vpop.xlane.xlu1 %263 }
 0x18a   : > { %688 = vrcp.f32 %v264_v29 }
 0x190   : > { %v689_v31 = vpop.eup %688 }
 0x191   : > { %v267_v30 = vpop.xlane.xlu2 %266  ;;  %v270_v34 = vmul.f32 %v689_v31, %v685_v15 }
 0x192   : > { %690 = vrcp.f32 %v267_v30 }
 0x198   : > { %v691_v32 = vpop.eup %690 }
 0x199   : > { %v437_v33 = vpop.permute.xlu2 %436  ;;  %v271_v35 = vmul.f32 %v691_v32, %v687_v22 }
 0x19a   : > { %659 = vmatmul.msk.bf16.vlgmr.msrb.gmra.mxu0 %vm228_vm0, %v437_v33 }
 0x19b   : > { %v272_v36 = vpack.c.bf16 %v271_v35, %v270_v34 }
 0x19d   : > { %654 = vmatmul.msk.bf16.vlgmr.msra.gmra.mxu1 %vm249_vm1, %v272_v36 }
 0x1ad   : > { %657 = vmatmul.msk.bf16.vlgmr.msrb.gmra.mxu1 %vm228_vm0, %v368_v37 }
 0x1d2   : > { %v327_v38 = vpop.xlane.xlu2 %326 }
 0x1d3   : > { %v329_v39 = vsub.f32 %v319_v24, %v327_v38 }
 0x1d5   : > { %v332_v40 = vmul.f32 1.442695, %v329_v39 }
 0x1d7   : > { %692 = vpow2.f32 %v332_v40 }
 0x1d8   : > { %694 = vpow2.f32 %v330_v58 }
 0x1da   : > { %v346_v3 = vpop.permute.xlu2 %345 }
 0x1db   : > { %358 = vmatpush.bf16.msra.mxu3 %v346_v3 }
 0x1dd   : > { %v798_v41 = vpop.eup %692 }
 0x1de   : > { %v337_v42 = vsel %vm249_vm1, %v798_v41, 0.0  ;;  %v695_v61 = vpop.eup %694 }
 0x1df   : > { %338 = vadd.xlane.f32.xlu0 %v337_v42  ;;  %v334_v62 = vsel %vm249_vm1, %v695_v61, 0.0 }
 0x217   : > { %v455_v43 = vpop.f32.mrf.mxu0 }
 0x218   : > { %v460_v44 = vsel %vm249_vm1, %v455_v43, -inf }
 0x219   : > { %461 = vmax.xlane.f32.xlu1 %v460_v44 }
 0x21a   : > { %v291_v45 = vpop.f32.mrf.mxu1 }
 0x21b   : > { %v296_v48 = vpack.c.bf16 %v291_v45, %v291_v45 }
 0x21d   : > { %v804_v51 = vunpack.c.l.b16 %v296_v48 }
 0x21f   : > { %v457_v46 = vpop.f32.mrf.mxu0 }
 0x220   : > { %v463_v47 = vsel %vm249_vm1, %v457_v46, -inf }
 0x221   : > { %464 = vmax.xlane.f32.xlu1 %v463_v47 }
 0x222   : > { %v293_v49 = vpop.f32.mrf.mxu1 }
 0x223   : > { %v297_v50 = vpack.c.bf16 %v293_v49, %v293_v49 }
 0x225   : > { %v806_v52 = vunpack.c.l.b16 %v297_v50 }
 0x227   : > { %v509_v54 = vpack.c.b16 %v806_v52, %v804_v51 }
 0x22a   : > { %v386_v56 = vpop.f32.mrf.mxu1 }
 0x22b   : > { %v391_v57 = vsel %vm249_vm1, %v386_v56, -inf }
 0x22c   : > { %392 = vmax.xlane.f32.xlu1 %v391_v57 }
 0x232   : > { %v388_v59 = vpop.f32.mrf.mxu1 }
 0x233   : > { %v394_v60 = vsel %vm249_vm1, %v388_v59, -inf }
 0x234   : > { %395 = vmax.xlane.f32.xlu1 %v394_v60 }
 0x23c   : > { %335 = vadd.xlane.f32.xlu1 %v334_v62 }
 0x252   : > { %v339_v17 = vpop.xlane.xlu0 %338 }
 0x28c   : > { %v462_v63 = vpop.xlane.xlu1 %461 }
 0x28d   : > { %v466_v0 = vsub.f32 %v455_v43, %v462_v63 }
 0x28f   : > { %v468_v1 = vmul.f32 1.442695, %v466_v0 }
 0x291   : > { %696 = vpow2.f32 %v468_v1 }
 0x294   : > { %v465_v2 = vpop.xlane.xlu1 %464 }
 0x295   : > { %v467_v4 = vsub.f32 %v457_v46, %v465_v2 }
 0x297   : > { %v697_v5 = vpop.eup %696  ;;  %v470_v6 = vmul.f32 1.442695, %v467_v4 }
 0x298   : > { %v472_v7 = vsel %vm249_vm1, %v697_v5, 0.0 }
 0x299   : > { %698 = vpow2.f32 %v470_v6  ;;  %473 = vadd.xlane.f32.xlu1 %v472_v7 }
 0x29f   : > { %v699_v8 = vpop.eup %698  ;;  %v393_v9 = vpop.xlane.xlu1 %392 }
 0x2a0   : > { %v397_v10 = vsub.f32 %v386_v56, %v393_v9  ;;  %v475_v11 = vsel %vm249_vm1, %v699_v8, 0.0 }
 0x2a1   : > { %476 = vadd.xlane.f32.xlu0 %v475_v11 }
 0x2a2   : > { %v399_v12 = vmul.f32 1.442695, %v397_v10 }
 0x2a4   : > { %700 = vpow2.f32 %v399_v12 }
 0x2a7   : > { %v396_v13 = vpop.xlane.xlu1 %395 }
 0x2a8   : > { %v398_v14 = vsub.f32 %v388_v59, %v396_v13 }
 0x2aa   : > { %v701_v15 = vpop.eup %700  ;;  %v401_v16 = vmul.f32 1.442695, %v398_v14 }
 0x2ab   : > { %v403_v18 = vsel %vm249_vm1, %v701_v15, 0.0 }
 0x2ac   : > { %702 = vpow2.f32 %v401_v16  ;;  %404 = vadd.xlane.f32.xlu1 %v403_v18 }
 0x2ad   : > { %704 = vrcp.f32 %v339_v17 }
 0x2af   : > { %v336_v19 = vpop.xlane.xlu1 %335 }
 0x2b0   : > { %706 = vrcp.f32 %v336_v19 }
 0x2b2   : > { %v703_v20 = vpop.eup %702 }
 0x2b3   : > { %v406_v21 = vsel %vm249_vm1, %v703_v20, 0.0  ;;  %v705_v22 = vpop.eup %704 }
 0x2b4   : > { %407 = vadd.xlane.f32.xlu0 %v406_v21  ;;  %v343_v25 = vmul.f32 %v705_v22, %v798_v41 }
 0x2b6   : > { %v707_v23 = vpop.eup %706 }
 0x2b7   : > { %v342_v24 = vmul.f32 %v707_v23, %v695_v61 }
 0x2b9   : > { %v344_v27 = vpack.c.bf16 %v343_v25, %v342_v24 }
 0x2bb   : > { %656 = vmatmul.msk.bf16.vlgmr.msra.gmra.mxu3 %vm249_vm1, %v344_v27 }
 0x2c5   : > { %414 = vrot.lane.b32.xlu1 %v789_v26, %s726_s23 }
 0x2c8   : > { %483 = vrot.lane.b32.xlu0 %v789_v26, %s725_s22 }
 0x30c   : > { %v474_v29 = vpop.xlane.xlu1 %473 }
 0x314   : > { %v477_v28 = vpop.xlane.xlu0 %476 }
 0x31f   : > { %v405_v31 = vpop.xlane.xlu1 %404 }
 0x327   : > { %v408_v30 = vpop.xlane.xlu0 %407 }
 0x328   : > { %708 = vrcp.f32 %v408_v30 }
 0x329   : > { %710 = vrcp.f32 %v405_v31 }
 0x32a   : > { %712 = vrcp.f32 %v477_v28 }
 0x32b   : > { %714 = vrcp.f32 %v474_v29 }
 0x32e   : > { %v709_v32 = vpop.eup %708 }
 0x32f   : > { %v711_v33 = vpop.eup %710  ;;  %v412_v35 = vmul.f32 %v709_v32, %v703_v20 }
 0x330   : > { %v713_v34 = vpop.eup %712  ;;  %v411_v37 = vmul.f32 %v711_v33, %v701_v15 }
 0x331   : > { %v715_v36 = vpop.eup %714  ;;  %v481_v39 = vmul.f32 %v713_v34, %v699_v8 }
 0x332   : > { %v413_v40 = vpack.c.bf16 %v412_v35, %v411_v37  ;;  %v480_v41 = vmul.f32 %v715_v36, %v697_v5 }
 0x334   : > { %v482_v42 = vpack.c.bf16 %v481_v39, %v480_v41 }
 0x337   : > { %v415_v38 = vpop.permute.xlu1 %414 }
 0x338   : > { %427 = vmatpush.bf16.msrb.mxu3 %v415_v38 }
 0x33a   : > { %v484_v26 = vpop.permute.xlu0 %483 }
 0x33b   : > { %658 = vmatmul.msk.bf16.vlgmr.msrb.gmra.mxu3 %vm249_vm1, %v413_v40  ;;  %496 = vmatpush.bf16.msrb.mxu2 %v484_v26 }
 0x33e   : > { %v360_v43 = vpop.f32.mrf.mxu3  ;;  %660 = vmatmul.msk.bf16.vlgmr.msrb.gmra.mxu2 %vm249_vm1, %v482_v42 }
 0x33f   : > { %v365_v44 = vpack.c.bf16 %v360_v43, %v360_v43 }
 0x341   : > { %v512_v47 = vunpack.c.l.b16 %v365_v44 }
 0x346   : > { %v362_v45 = vpop.f32.mrf.mxu3 }
 0x347   : > { %v366_v46 = vpack.c.bf16 %v362_v45, %v362_v45 }
 0x349   : > { %v513_v48 = vunpack.c.l.b16 %v366_v46 }
 0x34b   : > { %v514_v49 = vpack.c.b16 %v513_v48, %v512_v47 }
 0x34d   : > { %515 = vrot.lane.b32.xlu2 %v514_v49, %s727_s27 }
 0x3a7   : > { %v516_v3 = vpop.permute.xlu2 %515 }
 0x3a8   : > { %v533_v5 = vsel %vm228_vm0, %v509_v54, %v516_v3 }
 0x3be   : > { %v429_v50 = vpop.f32.mrf.mxu3 }
 0x3bf   : > { %v434_v55 = vpack.c.bf16 %v429_v50, %v429_v50 }
 0x3c1   : > { %v498_v53 = vpop.f32.mrf.mxu2  ;;  %v519_v58 = vunpack.c.l.b16 %v434_v55 }
 0x3c2   : > { %v503_v63 = vpack.c.bf16 %v498_v53, %v498_v53 }
 0x3c4   : > { %v526_v1 = vunpack.c.l.b16 %v503_v63 }
 0x3c6   : > { %v431_v56 = vpop.f32.mrf.mxu3 }
 0x3c7   : > { %v435_v57 = vpack.c.bf16 %v431_v56, %v431_v56 }
 0x3c9   : > { %v520_v59 = vunpack.c.l.b16 %v435_v57  ;;  %v500_v60 = vpop.f32.mrf.mxu2 }
 0x3ca   : > { %v504_v62 = vpack.c.bf16 %v500_v60, %v500_v60 }
 0x3cb   : > { %v521_v61 = vpack.c.b16 %v520_v59, %v519_v58 }
 0x3cc   : > { %v527_v0 = vunpack.c.l.b16 %v504_v62 }
 0x3cd   : > { %522 = vrot.lane.b32.xlu2 %v521_v61, %s728_s28 }
 0x3ce   : > { %v528_v2 = vpack.c.b16 %v527_v0, %v526_v1 }
 0x3d5   : > { %529 = vrot.lane.b32.xlu2 %v528_v2, %s729_s29 }
 0x427   : > { %v523_v4 = vpop.permute.xlu2 %522 }
 0x428   : > { %v535_v6 = vsel %vm249_vm1, %v533_v5, %v523_v4 }
 0x42f   : > { %v530_v7 = vpop.permute.xlu2 %529 }
 0x430   : > { %v538_v8 = vsel %vm536_vm2, %v535_v6, %v530_v7 }
 0x431   : > { %v540_v9 = vunpack.c.l.b16 %v538_v8  ;;  %v541_v10 = vunpack.c.h.b16 %v538_v8 }
 0x433   : > { %v542_v11 = vpack.c.b16 %v540_v9, %v540_v9  ;;  %v543_v12 = vpack.c.b16 %v541_v10, %v541_v10 }
 0x435   : > { %547 = vst.msk [vmem:[%s210_s5] sm:$0xf] %vm546_vm3, %v542_v11 }
 0x436   : > { %548 = vst.msk [vmem:[%s210_s5 + $0x4] sm:$0xf] %vm546_vm3, %v543_v12 }
 0x437 PF: > { %s13_s12 = sadd.s32 1, %s722_s12  }
 0x438   : > { %p10_p4 = scmp.ge.s32.totalorder %s13_s12, 4  }
 0x43a   :  { %12 = sbr.rel (!%p10_p4) target bundleno = 1 (0x1), region = 68 }

// kernel: dit_forward.25
= control target key start
LH: loop header
LB: loop body
LE: loop exit
PB: predicated region body
PF: predicated region fallthrough
CT: control target
= control target key end

     0   :  { %s796_s18 = smov 0   ;;  %s798_s19 = smov 0   ;;  %s862_s0 = inlined_call_operand.vmem [shape: bf16[2,16,128], index: 0, kind: input, shape index: {}]   ;;  %s863_s1 = inlined_call_operand.vmem [shape: bf16[2,16,32], index: 1, kind: input, shape index: {}, may-alias: {1,5}]   ;;  %s864_s2 = inlined_call_operand.vmem [shape: f32[2,1,32], index: 2, kind: input, shape index: {}]   ;;  %s865_s3 = inlined_call_operand.vmem [shape: bf16[128,32], index: 3, kind: input, shape index: {}]   ;;  %s866_s4 = inlined_call_operand.vmem [shape: f32[1,32], index: 4, kind: input, shape index: {}]   ;;  %s867_s5 = inlined_call_operand.vmem [shape: bf16[2,16,32], index: 5, kind: output, shape index: {}, may-alias: {1,5}]  }
   0x1   :  { %s800_s20 = smov 0  }
   0x2 LB: > { %s30_s21 = sadd.s32 1, %s760_s19  ;;  %p655_p0 = scmp.ge.s32.totalorder %s764_s20, 1  ;;  %s764_s20 = sphi %s800_s20, %s15_s20   ;;  %s760_s19 = sphi %s798_s19, %s869_s19   ;;  %s756_s18 = sphi %s796_s18, %s868_s18  }
   0x3   : > { %p32_p1 = scmp.ge.s32.totalorder %s30_s21, 2  ;;  %p269_p2 = scmp.lt.s32.totalorder %s764_s20, 3 }
   0x5   : > { %s871_s21 = smov (%p32_p1, %s30_s21), 0  ;;  %p270_p3 = pnand %p655_p0, %p269_p2 }
   0x6   : > { %p334_p4 = scmp.lt.s32.totalorder (!%p270_p3), %s756_s18, 1 }
   0x7   : > { %273 = sbr.rel (%p270_p3) target bundleno = 187 (0xbb), region = 40 }
   0xc   : > { %v711_v0 = vld [vmem:[%s865_s3 + $0x38] sm:$0xff]  ;;  %v710_v1 = vld [vmem:[%s865_s3 + $0x30] sm:$0xff]  ;;  %s873_s18 = smov (!%p334_p4, %s756_s18), 1  ;;  %v709_v2 = vld [vmem:[%s865_s3 + $0x28] sm:$0xff]  ;;  %vm486_vm0 = vcmask 257024  }
   0xd   : > { %458 = vmatpush.bf16.msra.mxu0 %v711_v0  ;;  %s361_s28 = scalar_lea.vmem %s864_s2, %s873_s18  ;;  %v708_v3 = vld [vmem:[%s865_s3 + $0x20] sm:$0xff]  ;;  %v707_v4 = vld [vmem:[%s865_s3 + $0x18] sm:$0xff]  ;;  %v706_v5 = vld [vmem:[%s865_s3 + $0x10] sm:$0xff]  ;;  %s700_s14 = sshll.u32 %s873_s18, 3 }
   0xe   : > { %v705_v6 = vld [vmem:[%s865_s3 + $0x8] sm:$0xff]  ;;  %v704_v7 = vld [vmem:[%s865_s3] sm:$0xff]  ;;  %s341_s23 = scalar_lea.vmem %s862_s0, %s700_s14  ;;  %s354_s26 = scalar_lea.vmem %s863_s1, %s700_s14 }
   0xf   : > { %v703_v8 = vld [vmem:[%s341_s23] sm:$0xff]  ;;  %s380_s6 = scalar_lea.vmem %s867_s5, %s700_s14 }
  0x10   : > { %v740_v9 = vld [vmem:[%s866_s4] ss:$0 sm:$0xff] }
  0x11   : > { %459 = vmatpush.bf16.msra.mxu0 %v710_v1  ;;  %v713_v10 = vld [vmem:[%s354_s26] sm:$0xff]  }
  0x12   : > { %v741_v11 = vld [vmem:[%s361_s28] ss:$0 sm:$0xff]  ;;  %v714_v14 = vunpack.c.l.bf16 %v713_v10  ;;  %v715_v20 = vunpack.c.h.bf16 %v713_v10 }
  0x15   : > { %460 = vmatpush.bf16.msra.mxu0 %v709_v2 }
  0x19   : > { %461 = vmatpush.bf16.msra.mxu0 %v708_v3 }
  0x1d   : > { %462 = vmatpush.bf16.msra.mxu0 %v707_v4 }
  0x21   : > { %463 = vmatpush.bf16.msra.mxu0 %v706_v5 }
  0x25   : > { %464 = vmatpush.bf16.msra.mxu0 %v705_v6 }
  0x29   : > { %465 = vmatpush.bf16.msra.mxu0 %v704_v7 }
  0x2c   : > { %466 = vmatmul.bf16.vlgmr.msra.gmra.mxu0 %v703_v8 }
  0xa9   : > { %v467_v12 = vpop.f32.mrf.mxu0 }
  0xaa   : > { %v468_v13 = vadd.f32 %v740_v9, %v467_v12 }
  0xac   : > { %v480_v15 = vmul.f32 %v741_v11, %v468_v13 }
  0xae   : > { %v482_v16 = vadd.f32 %v714_v14, %v480_v15 }
  0xb0   : > { %v484_v17 = vpack.c.bf16 %v482_v16, %v482_v16 }
  0xb1   : > { %v469_v18 = vpop.f32.mrf.mxu0 }
  0xb2   : > { %487 = vst.msk [vmem:[%s380_s6] sm:$0xf] %vm486_vm0, %v484_v17  ;;  %v470_v19 = vadd.f32 %v740_v9, %v469_v18 }
  0xb4   : > { %v481_v21 = vmul.f32 %v741_v11, %v470_v19 }
  0xb6   : > { %v483_v22 = vadd.f32 %v715_v20, %v481_v21 }
  0xb8   : > { %v485_v23 = vpack.c.bf16 %v483_v22, %v483_v22 }
  0xba   : > { %488 = vst.msk [vmem:[%s380_s6 + $0x4] sm:$0xf] %vm486_vm0, %v485_v23 }
  0xbb PF: > { %s15_s20 = sadd.s32 1, %s764_s20   ;;  %s868_s18 = smov %s760_s19 }
  0xbc   : > { %p12_p5 = scmp.ge.s32.totalorder %s15_s20, 4   ;;  %s869_s19 = smov %s871_s21 }
  0xbe   :  { %14 = sbr.rel (!%p12_p5) target bundleno = 2 (0x2), region = 82 }

// kernel: dit_forward.31
= control target key start
LH: loop header
LB: loop body
LE: loop exit
PB: predicated region body
PF: predicated region fallthrough
CT: control target
= control target key end

     0   :  { %s657_s15 = smov 0   ;;  %s659_s16 = smov 0   ;;  %s712_s0 = inlined_call_operand.vmem [shape: bf16[2,16,32], index: 0, kind: input, shape index: {}]   ;;  %s713_s1 = inlined_call_operand.vmem [shape: f32[2,2,32], index: 1, kind: input, shape index: {}]   ;;  %s714_s2 = inlined_call_operand.vmem [shape: bf16[32,128], index: 2, kind: input, shape index: {}]   ;;  %s715_s3 = inlined_call_operand.vmem [shape: f32[1,128], index: 3, kind: input, shape index: {}]   ;;  %s716_s4 = inlined_call_operand.vmem [shape: f32[2,16,128], index: 4, kind: output, shape index: {}]  }
   0x1   :  { %s661_s17 = smov 0  }
   0x2 LB: > { %s29_s18 = sadd.s32 1, %s625_s16  ;;  %p550_p0 = scmp.ge.s32.totalorder %s629_s17, 1  ;;  %s629_s17 = sphi %s661_s17, %s14_s17   ;;  %s625_s16 = sphi %s659_s16, %s718_s16   ;;  %s621_s15 = sphi %s657_s15, %s717_s15  }
   0x3   : > { %p31_p1 = scmp.ge.s32.totalorder %s29_s18, 2  ;;  %p218_p2 = scmp.lt.s32.totalorder %s629_s17, 3 }
   0x5   : > { %s720_s18 = smov (%p31_p1, %s29_s18), 0  ;;  %p219_p3 = pnand %p550_p0, %p218_p2 }
   0x6   : > { %p267_p4 = scmp.lt.s32.totalorder (!%p219_p3), %s621_s15, 1 }
   0x7   : > { %222 = sbr.rel (%p219_p3) target bundleno = 433 (0x1b1), region = 36 }
   0xc   : > { %s722_s15 = smov (!%p267_p4, %s621_s15), 1  ;;  %vm306_vm0 = vcmask 261120   ;;  %v631_v5 = vmov 32.0   ;;  %v570_v22 = vld [vmem:[%s714_s2 + $0x8] sm:$0xff]  ;;  %v569_v24 = vld [vmem:[%s714_s2] sm:$0xff] }
   0xd   : > { %s567_s19 = sshll.u32 %s722_s15, 3  ;;  %601 = vrcp.f32 %v631_v5  ;;  %395 = vmatpush.bf16.msra.mxu0 %v570_v22  ;;  %s553_s27 = sshll.u32 %s722_s15, 1  ;;  %v600_v55 = vld [vmem:[%s715_s3] ss:$0 sm:$0xff] }
   0xe   : > { %s274_s22 = scalar_lea.vmem %s712_s0, %s567_s19  ;;  %s279_s30 = scalar_lea.vmem %s713_s1, %s553_s27 }
   0xf   : > { %v572_v0 = vld [vmem:[%s274_s22] sm:$0xff]   ;;  %s568_s5 = sshll.u32 %s722_s15, 4 }
  0x10   : > { %v573_v1 = vunpack.c.l.bf16 %v572_v0  ;;  %v574_v3 = vunpack.c.h.bf16 %v572_v0  ;;  %v305_v38 = vld [vmem:[%s279_s30] sm:$0x3]  ;;  %s298_s10 = scalar_lea.vmem %s716_s4, %s568_s5 }
  0x11   : > { %396 = vmatpush.bf16.msra.mxu0 %v569_v24  ;;  %v358_v40 = vadd.f32 1.0, %v305_v38  ;;  %v362_v50 = vperm.slane %v305_v38, 0 }
  0x12   : > { %v307_v2 = vsel %vm306_vm0, %v573_v1, 0.0  ;;  %v310_v4 = vsel %vm306_vm0, %v574_v3, 0.0 }
  0x13   : > { %308 = vadd.xlane.f32.xlu0 %v307_v2  ;;  %v602_v6 = vpop.eup %601  ;;  %v359_v45 = vperm.slane %v358_v40, 1 }
  0x14   : > { %v314_v7 = vmul.f32 32.0, %v602_v6  ;;  %vm318_vm1 = vweird.f32 %v602_v6 }
  0x16   : > { %v315_v8 = vsub.f32 1.0, %v314_v7 }
  0x18   : > { %v316_v9 = vmul.f32 %v602_v6, %v315_v8 }
  0x1a   : > { %v317_v10 = vadd.f32 %v602_v6, %v316_v9 }
  0x1b   : > { %311 = vadd.xlane.f32.xlu0 %v310_v4 }
  0x1c   : > { %v319_v11 = vsel %vm318_vm1, %v602_v6, %v317_v10 }
  0x86   : > { %v309_v12 = vpop.xlane.xlu0 %308 }
  0x87   : > { %v320_v13 = vmul.f32 %v319_v11, %v309_v12 }
  0x89   : > { %v322_v14 = vsub.f32 %v573_v1, %v320_v13 }
  0x8b   : > { %v324_v15 = vmul.f32 %v322_v14, %v322_v14 }
  0x8d   : > { %v326_v16 = vsel %vm306_vm0, %v324_v15, 0.0 }
  0x8e   : > { %327 = vadd.xlane.f32.xlu1 %v326_v16  ;;  %v312_v17 = vpop.xlane.xlu0 %311 }
  0x8f   : > { %v321_v18 = vmul.f32 %v319_v11, %v312_v17 }
  0x91   : > { %v323_v19 = vsub.f32 %v574_v3, %v321_v18 }
  0x93   : > { %v325_v20 = vmul.f32 %v323_v19, %v323_v19 }
  0x95   : > { %v329_v21 = vsel %vm306_vm0, %v325_v20, 0.0 }
  0x96   : > { %330 = vadd.xlane.f32.xlu1 %v329_v21 }
 0x101   : > { %v328_v23 = vpop.xlane.xlu1 %327 }
 0x102   : > { %v332_v25 = vmul.f32 %v328_v23, %v319_v11 }
 0x104   : > { %v334_v26 = vadd.f32 1e-06, %v332_v25 }
 0x106   : > { %603 = vrsqrt.f32 %v334_v26  ;;  %vm342_vm3 = vweird.f32 %v334_v26 }
 0x109   : > { %v331_v27 = vpop.xlane.xlu1 %330 }
 0x10a   : > { %v333_v28 = vmul.f32 %v331_v27, %v319_v11 }
 0x10c   : > { %v604_v29 = vpop.eup %603  ;;  %v335_v30 = vadd.f32 1e-06, %v333_v28 }
 0x10d   : > { %v337_v31 = vmul.f32 %v604_v29, %v334_v26  ;;  %vm343_vm2 = vweird.f32 %v604_v29 }
 0x10e   : > { %605 = vrsqrt.f32 %v335_v30  ;;  %vm344_vm4 = vmor %vm342_vm3, %vm343_vm2  ;;  %vm352_vm6 = vweird.f32 %v335_v30 }
 0x10f   : > { %v338_v32 = vmul.f32 %v604_v29, %v337_v31 }
 0x111   : > { %v339_v33 = vmul.f32 0.5, %v338_v32 }
 0x113   : > { %v340_v34 = vsub.f32 1.5, %v339_v33 }
 0x114   : > { %v606_v35 = vpop.eup %605 }
 0x115   : > { %v341_v36 = vmul.f32 %v604_v29, %v340_v34  ;;  %v347_v37 = vmul.f32 %v606_v35, %v335_v30  ;;  %vm353_vm5 = vweird.f32 %v606_v35 }
 0x116   : > { %vm354_vm7 = vmor %vm352_vm6, %vm353_vm5 }
 0x117   : > { %v348_v39 = vmul.f32 %v606_v35, %v347_v37  ;;  %v345_v41 = vsel %vm344_vm4, %v604_v29, %v341_v36 }
 0x118   : > { %v356_v44 = vmul.f32 %v345_v41, %v322_v14 }
 0x119   : > { %v349_v42 = vmul.f32 0.5, %v348_v39 }
 0x11a   : > { %v360_v49 = vmul.f32 %v359_v45, %v356_v44 }
 0x11b   : > { %v350_v43 = vsub.f32 1.5, %v349_v42 }
 0x11c   : > { %v363_v52 = vadd.f32 %v362_v50, %v360_v49 }
 0x11d   : > { %v351_v46 = vmul.f32 %v606_v35, %v350_v43 }
 0x11f   : > { %v355_v47 = vsel %vm354_vm7, %v606_v35, %v351_v46 }
 0x120   : > { %v357_v48 = vmul.f32 %v355_v47, %v323_v19 }
 0x122   : > { %v361_v51 = vmul.f32 %v359_v45, %v357_v48 }
 0x124   : > { %v364_v53 = vadd.f32 %v362_v50, %v361_v51 }
 0x126   : > { %v365_v54 = vpack.c.bf16 %v364_v53, %v363_v52 }
 0x128   : > { %564 = vmatmul.msk.bf16.vlgmr.msra.gmra.mxu0 %vm306_vm0, %v365_v54 }
 0x1a5   : > { %v398_v56 = vpop.f32.mrf.mxu0 }
 0x1a6   : > { %v399_v57 = vadd.f32 %v600_v55, %v398_v56 }
 0x1a8   : > { %403 = vst [vmem:[%s298_s10] sm:$0xff] %v399_v57 }
 0x1ad   : > { %v400_v58 = vpop.f32.mrf.mxu0 }
 0x1ae   : > { %v401_v59 = vadd.f32 %v600_v55, %v400_v58 }
 0x1b0   : > { %404 = vst [vmem:[%s298_s10 + $0x8] sm:$0xff] %v401_v59 }
 0x1b1 PF: > { %s14_s17 = sadd.s32 1, %s629_s17   ;;  %s717_s15 = smov %s625_s16 }
 0x1b2   : > { %p11_p5 = scmp.ge.s32.totalorder %s14_s17, 4   ;;  %s718_s16 = smov %s720_s18 }
 0x1b4   :  { %13 = sbr.rel (!%p11_p5) target bundleno = 2 (0x2), region = 75 }

</bundles_post_ra>
